<compile_context>
chip_gen: v6e
topology: v6e:2x2x1
jax: 0.10.0
libtpu: 0.0.40
codegen_flags: <defaults>
</compile_context>

<pallas_src>
import jax
import jax.numpy as jnp
from jax import lax
from jax.experimental import pallas as pl
from jax.experimental.pallas import tpu as pltpu  # noqa: F401

# ----------------------------- model config (scaled-down ViT/16) -------------
PATCH = 16
IMG = 32            # 32x32 image -> 2x2 = 4 patches
IN_CH = 3
DIM = 64            # embedding dim (ViT-S is 384; scaled down)
DEPTH = 2           # encoder blocks (ViT-S is 12)
HEADS = 4
MLP_DIM = 128
NUM_CLASSES = 10
LN_EPS = 1e-6       # torchvision ViT uses LayerNorm(eps=1e-6)
HEAD_DIM = DIM // HEADS
N_TOKENS = (IMG // PATCH) ** 2 + 1
LANE = 128          # lane width used for padded bias slabs / logits

# row indices inside the packed per-depth vector slab (DEPTH, 10, LANE)
(V_LN1G, V_LN1B, V_BQ, V_BK, V_BV, V_BPROJ,
 V_LN2G, V_LN2B, V_BFC1, V_BFC2) = range(10)

_SQRT_2_OVER_PI = 0.7978845608028654


def _gelu_tanh(x):
    return 0.5 * x * (1.0 + jnp.tanh(_SQRT_2_OVER_PI * (x + 0.044715 * x * x * x)))


def _layernorm(x, g, b):
    mu = jnp.mean(x, axis=-1, keepdims=True)
    xc = x - mu
    var = jnp.mean(xc * xc, axis=-1, keepdims=True)
    return xc * lax.rsqrt(var + LN_EPS) * g + b


# ----------------------------- fused forward kernel ---------------------------
def _vit_fwd_kernel(
    patches_ref,    # (R, CPP)                 bf16  packed rows: [img0 cls, img0 p0.., img1 cls, .., pad]
    row_add_ref,    # (R, DIM)                 f32   conv bias + pos (+ cls token on cls rows)
    bias_ref,       # (R, R)                   f32   block-diagonal per-image attention bias
    patch_w_ref,    # (CPP, DIM)               bf16
    qkv_w_ref,      # (DEPTH, 3, DIM, DIM)     bf16  [Wq, Wk, Wv]
    proj_w_ref,     # (DEPTH, HEADS, DIM, DIM) bf16  per-head row-masked projection weights
    fc1_w_ref,      # (DEPTH, DIM, MLP_DIM)    bf16
    fc2_w_ref,      # (DEPTH, MLP_DIM, DIM)    bf16
    head_w_ref,     # (DIM, LANE)              bf16  zero-padded cols >= NUM_CLASSES
    vecs_ref,       # (DEPTH, 10, LANE)        f32   LN gains/biases + q/k/v/proj/fc biases
    final_ref,      # (3, LANE)                f32   final LN gain/bias + head bias
    out_ref,        # (R, LANE)                f32   lane-dense logits for every packed row
):
    R = patches_ref.shape[0]
    scale = 1.0 / float(HEAD_DIM) ** 0.5

    # Per-head lane masks with the 1/sqrt(Dh) scale folded in.  Masking q instead of
    # slicing keeps every attention matmul a plain full-width 2D dot (no 16-lane slices,
    # no reshapes, no relayouts).  Built once, pure VPU.
    lane = lax.broadcasted_iota(jnp.int32, (1, DIM), 1)
    head_mask = [
        jnp.where((lane >= h * HEAD_DIM) & (lane < (h + 1) * HEAD_DIM), scale, 0.0)
        for h in range(HEADS)
    ]

    # ---- patch embedding; cls token + positional embedding folded into row_add ----
    x = jnp.dot(patches_ref[...], patch_w_ref[...],
                preferred_element_type=jnp.float32) + row_add_ref[...]       # (R, DIM) f32
    bias = bias_ref[...]

    # DEPTH=2 -> static unroll is fine; switch to lax.fori_loop / a depth grid axis
    # once DEPTH grows (see TODO in the header).
    for d in range(DEPTH):
        vd = vecs_ref[d]                                                     # (10, LANE)

        # ---- multi-head self-attention ----
        h_ln = _layernorm(x, vd[V_LN1G:V_LN1G + 1, :DIM], vd[V_LN1B:V_LN1B + 1, :DIM])
        h16 = h_ln.astype(jnp.bfloat16)
        q = jnp.dot(h16, qkv_w_ref[d, 0],
                    preferred_element_type=jnp.float32) + vd[V_BQ:V_BQ + 1, :DIM]
        k = jnp.dot(h16, qkv_w_ref[d, 1],
                    preferred_element_type=jnp.float32) + vd[V_BK:V_BK + 1, :DIM]
        v = jnp.dot(h16, qkv_w_ref[d, 2],
                    preferred_element_type=jnp.float32) + vd[V_BV:V_BV + 1, :DIM]
        k16 = k.astype(jnp.bfloat16)
        v16 = v.astype(jnp.bfloat16)

        attn = jnp.zeros((R, DIM), jnp.float32)
        for hd in range(HEADS):
            # masked-q trick: contract over the full DIM; other heads' lanes are zero.
            q_h = (q * head_mask[hd]).astype(jnp.bfloat16)
            s = lax.dot_general(q_h, k16, (((1,), (1,)), ((), ())),
                                preferred_element_type=jnp.float32)          # (R, R)
            s = s + bias
            s = s - jnp.max(s, axis=-1, keepdims=True)
            e = jnp.exp(s)
            p_attn = e * pl.reciprocal(jnp.sum(e, axis=-1, keepdims=True), approx=False)
            # (p @ v_h) @ Wproj_h == p @ (v @ Wproj_row_masked_h): full-width matmuls.
            vproj = jnp.dot(v16, proj_w_ref[d, hd],
                            preferred_element_type=jnp.float32)              # (R, DIM)
            attn = attn + jnp.dot(p_attn.astype(jnp.bfloat16),
                                  vproj.astype(jnp.bfloat16),
                                  preferred_element_type=jnp.float32)
        x = x + attn + vd[V_BPROJ:V_BPROJ + 1, :DIM]                         # residual

        # ---- MLP ----
        h2 = _layernorm(x, vd[V_LN2G:V_LN2G + 1, :DIM], vd[V_LN2B:V_LN2B + 1, :DIM])
        h2 = jnp.dot(h2.astype(jnp.bfloat16), fc1_w_ref[d],
                     preferred_element_type=jnp.float32) + vd[V_BFC1:V_BFC1 + 1, :]
        h2 = _gelu_tanh(h2)
        h2 = jnp.dot(h2.astype(jnp.bfloat16), fc2_w_ref[d],
                     preferred_element_type=jnp.float32) + vd[V_BFC2:V_BFC2 + 1, :DIM]
        x = x + h2                                                           # residual

    # ---- final LayerNorm + classification head (all rows; wrapper picks cls rows) ----
    fin = final_ref[...]
    xf = _layernorm(x, fin[0:1, :DIM], fin[1:2, :DIM])
    out_ref[...] = jnp.dot(xf.astype(jnp.bfloat16), head_w_ref[...],
                           preferred_element_type=jnp.float32) + fin[2:3, :]


# ----------------------------- wrapper ----------------------------------------
def _round_up(n, m):
    return (n + m - 1) // m * m


def vit_forward(params, x):
    """x: (B, C, H, W) float32 NCHW (like PyTorch). Returns (B, NUM_CLASSES) f32."""
    B, C, H, W = x.shape
    gh, gw = H // PATCH, W // PATCH
    n_patch = gh * gw
    T = n_patch + 1
    CPP = C * PATCH * PATCH
    R = _round_up(B * T, 8)                          # batch packed into sublanes

    # patchify: (B, C, gh, P, gw, P) -> (B, gh*gw, C*P*P), inner order (c, ph, pw)
    p = x.reshape(B, C, gh, PATCH, gw, PATCH)
    p = p.transpose(0, 2, 4, 1, 3, 5).reshape(B, n_patch, CPP)
    p = jnp.pad(p, ((0, 0), (1, 0), (0, 0)))         # zero cls-placeholder row per image
    rows = p.reshape(B * T, CPP)
    rows = jnp.pad(rows, ((0, R - B * T), (0, 0))).astype(jnp.bfloat16)

    # fold conv bias + cls token + positional embedding into one per-row additive slab
    per_img = jnp.concatenate(
        [params["cls"] + params["pos"][0:1],                        # cls row: cls + pos[0]
         params["pos"][1:] + params["patch_b"]], axis=0)            # patch rows: pos + bias
    row_add = jnp.tile(per_img, (B, 1))
    row_add = jnp.pad(row_add, ((0, R - B * T), (0, 0))).astype(jnp.float32)

    # block-diagonal attention bias: tokens attend only within their own image;
    # padding rows form their own group so their softmax stays finite.
    seg = jnp.arange(R, dtype=jnp.int32) // T
    attn_bias = jnp.where(seg[:, None] == seg[None, :], 0.0, -1e9).astype(jnp.float32)

    # ---- weights (matmul weights in bf16 for the MXU) ----
    patch_w = params["patch_w"].astype(jnp.bfloat16)                           # (CPP, DIM)
    qkv_w = params["qkv_w"].reshape(DEPTH, DIM, 3, DIM).transpose(0, 2, 1, 3)
    qkv_w = qkv_w.astype(jnp.bfloat16)                                         # (D,3,DIM,DIM)
    head_row = jnp.arange(DIM, dtype=jnp.int32) // HEAD_DIM
    rowmask = head_row[None, :] == jnp.arange(HEADS, dtype=jnp.int32)[:, None]  # (H, DIM)
    proj_hm = params["proj_w"][:, None, :, :] * rowmask[None, :, :, None]
    proj_hm = proj_hm.astype(jnp.bfloat16)                                     # (D,H,DIM,DIM)
    fc1_w = params["fc1_w"].astype(jnp.bfloat16)
    fc2_w = params["fc2_w"].astype(jnp.bfloat16)
    head_w = jnp.pad(params["head_w"],
                     ((0, 0), (0, LANE - NUM_CLASSES))).astype(jnp.bfloat16)   # (DIM, LANE)

    # ---- pack all per-depth vectors (LN gains/biases + biases) into one f32 slab ----
    qkv_b = params["qkv_b"].reshape(DEPTH, 3, DIM)

    def lane_pad(a):                      # (DEPTH, k) -> (DEPTH, 1, LANE)
        return jnp.pad(a, ((0, 0), (0, LANE - a.shape[-1])))[:, None, :]

    vecs = jnp.concatenate([
        lane_pad(params["ln1_g"]), lane_pad(params["ln1_b"]),
        lane_pad(qkv_b[:, 0]), lane_pad(qkv_b[:, 1]), lane_pad(qkv_b[:, 2]),
        lane_pad(params["proj_b"]),
        lane_pad(params["ln2_g"]), lane_pad(params["ln2_b"]),
        lane_pad(params["fc1_b"]), lane_pad(params["fc2_b"]),
    ], axis=1).astype(jnp.float32)                                             # (D,10,LANE)

    def lane_pad1(a):                     # (k,) -> (1, LANE)
        return jnp.pad(a, ((0, LANE - a.shape[-1]),))[None, :]

    final_vecs = jnp.concatenate([
        lane_pad1(params["ln_f_g"]), lane_pad1(params["ln_f_b"]),
        lane_pad1(params["head_b"]),
    ], axis=0).astype(jnp.float32)                                             # (3, LANE)

    # Single invocation, no grid: whole batch + all weights (<0.5 MB bf16) VMEM-resident,
    # one lane-dense (R, 128) f32 output store.
    out = pl.pallas_call(
        _vit_fwd_kernel,
        out_shape=jax.ShapeDtypeStruct((R, LANE), jnp.float32),
    )(rows, row_add, attn_bias, patch_w, qkv_w, proj_hm, fc1_w, fc2_w,
      head_w, vecs, final_vecs)

    cls_rows = jnp.arange(B, dtype=jnp.int32) * T                 # cls token of each image
    return out[cls_rows, :NUM_CLASSES]


# ----------------------------- parameters ------------------------------------
def init_params(key):
    def dense(k, fan_in, fan_out):
        w = jax.random.normal(k, (fan_in, fan_out), jnp.float32) * 0.02
        b = jnp.zeros((fan_out,), jnp.float32)
        return w, b

    keys = jax.random.split(key, 4 + 4 * DEPTH)
    params = {}
    CPP = IN_CH * PATCH * PATCH
    # patch embedding == Conv2d(C, D, kernel=P, stride=P), weight flattened (c, ph, pw)
    pw, pb = dense(keys[0], CPP, DIM)
    params["patch_w"], params["patch_b"] = pw, pb.reshape(1, DIM)
    params["cls"] = jax.random.normal(keys[1], (1, DIM), jnp.float32) * 0.02
    params["pos"] = jax.random.normal(keys[2], (N_TOKENS, DIM), jnp.float32) * 0.02
    hw, hb = dense(keys[3], DIM, NUM_CLASSES)
    params["head_w"], params["head_b"] = hw, hb
    params["ln_f_g"] = jnp.ones((DIM,), jnp.float32)
    params["ln_f_b"] = jnp.zeros((DIM,), jnp.float32)

    qkv_w, qkv_b, proj_w, proj_b = [], [], [], []
    fc1_w, fc1_b, fc2_w, fc2_b = [], [], [], []
    for d in range(DEPTH):
        kq, kp, k1, k2 = keys[4 + 4 * d: 8 + 4 * d]
        w, b = dense(kq, DIM, 3 * DIM); qkv_w.append(w); qkv_b.append(b)
        w, b = dense(kp, DIM, DIM);     proj_w.append(w); proj_b.append(b)
        w, b = dense(k1, DIM, MLP_DIM); fc1_w.append(w); fc1_b.append(b)
        w, b = dense(k2, MLP_DIM, DIM); fc2_w.append(w); fc2_b.append(b)
    params["qkv_w"], params["qkv_b"] = jnp.stack(qkv_w), jnp.stack(qkv_b)
    params["proj_w"], params["proj_b"] = jnp.stack(proj_w), jnp.stack(proj_b)
    params["fc1_w"], params["fc1_b"] = jnp.stack(fc1_w), jnp.stack(fc1_b)
    params["fc2_w"], params["fc2_b"] = jnp.stack(fc2_w), jnp.stack(fc2_b)
    params["ln1_g"] = jnp.ones((DEPTH, DIM), jnp.float32)
    params["ln1_b"] = jnp.zeros((DEPTH, DIM), jnp.float32)
    params["ln2_g"] = jnp.ones((DEPTH, DIM), jnp.float32)
    params["ln2_b"] = jnp.zeros((DEPTH, DIM), jnp.float32)
    return params


# ----------------------------- main -------------------------------------------
if __name__ == "__main__":
    key = jax.random.PRNGKey(0)
    k_param, k_x = jax.random.split(key)
    params = init_params(k_param)
    x = jax.random.normal(k_x, (2, IN_CH, IMG, IMG), jnp.float32)  # NCHW, batch=2

    fwd = jax.jit(vit_forward)
    logits = fwd(params, x)
    jax.block_until_ready(logits)
    assert logits.shape == (2, NUM_CLASSES)
    assert bool(jnp.all(jnp.isfinite(logits)))
    print("KERNEL_OK")
</pallas_src>

<mosaic_0001>
module attributes {stable_mosaic.version = 11 : i64} {
  func.func @_vit_fwd_kernel(%arg0: memref<16x768xbf16, #tpu.memory_space<vmem>>, %arg1: memref<16x64xf32, #tpu.memory_space<vmem>>, %arg2: memref<16x16xf32, #tpu.memory_space<vmem>>, %arg3: memref<768x64xbf16, #tpu.memory_space<vmem>>, %arg4: memref<2x3x64x64xbf16, #tpu.memory_space<vmem>>, %arg5: memref<2x4x64x64xbf16, #tpu.memory_space<vmem>>, %arg6: memref<2x64x128xbf16, #tpu.memory_space<vmem>>, %arg7: memref<2x128x64xbf16, #tpu.memory_space<vmem>>, %arg8: memref<64x128xbf16, #tpu.memory_space<vmem>>, %arg9: memref<2x10x128xf32, #tpu.memory_space<vmem>>, %arg10: memref<3x128xf32, #tpu.memory_space<vmem>>, %arg11: memref<16x128xf32, #tpu.memory_space<vmem>>) attributes {dimension_semantics = [], scalar_prefetch = 0 : i64, scratch_operands = 0 : i64, tpu.core_type = #tpu.core_type<tc>} {
    %0 = tpu.iota {dimensions = array<i32: 1>} : vector<1x64xi32>
    %c0_i32 = arith.constant 0 : i32
    %1 = vector.broadcast %c0_i32 : i32 to vector<1x64xi32>
    %2 = arith.cmpi sge, %0, %1 : vector<1x64xi32>
    %c16_i32 = arith.constant 16 : i32
    %3 = vector.broadcast %c16_i32 : i32 to vector<1x64xi32>
    %4 = arith.cmpi slt, %0, %3 : vector<1x64xi32>
    %5 = arith.andi %2, %4 : vector<1x64xi1>
    %cst = arith.constant 2.500000e-01 : f32
    %cst_0 = arith.constant 0.000000e+00 : f32
    %6 = vector.broadcast %cst : f32 to vector<1x64xf32>
    %7 = vector.broadcast %cst_0 : f32 to vector<1x64xf32>
    %8 = arith.select %5, %6, %7 : vector<1x64xi1>, vector<1x64xf32>
    %c16_i32_1 = arith.constant 16 : i32
    %9 = vector.broadcast %c16_i32_1 : i32 to vector<1x64xi32>
    %10 = arith.cmpi sge, %0, %9 : vector<1x64xi32>
    %c32_i32 = arith.constant 32 : i32
    %11 = vector.broadcast %c32_i32 : i32 to vector<1x64xi32>
    %12 = arith.cmpi slt, %0, %11 : vector<1x64xi32>
    %13 = arith.andi %10, %12 : vector<1x64xi1>
    %cst_2 = arith.constant 2.500000e-01 : f32
    %cst_3 = arith.constant 0.000000e+00 : f32
    %14 = vector.broadcast %cst_2 : f32 to vector<1x64xf32>
    %15 = vector.broadcast %cst_3 : f32 to vector<1x64xf32>
    %16 = arith.select %13, %14, %15 : vector<1x64xi1>, vector<1x64xf32>
    %c32_i32_4 = arith.constant 32 : i32
    %17 = vector.broadcast %c32_i32_4 : i32 to vector<1x64xi32>
    %18 = arith.cmpi sge, %0, %17 : vector<1x64xi32>
    %c48_i32 = arith.constant 48 : i32
    %19 = vector.broadcast %c48_i32 : i32 to vector<1x64xi32>
    %20 = arith.cmpi slt, %0, %19 : vector<1x64xi32>
    %21 = arith.andi %18, %20 : vector<1x64xi1>
    %cst_5 = arith.constant 2.500000e-01 : f32
    %cst_6 = arith.constant 0.000000e+00 : f32
    %22 = vector.broadcast %cst_5 : f32 to vector<1x64xf32>
    %23 = vector.broadcast %cst_6 : f32 to vector<1x64xf32>
    %24 = arith.select %21, %22, %23 : vector<1x64xi1>, vector<1x64xf32>
    %c48_i32_7 = arith.constant 48 : i32
    %25 = vector.broadcast %c48_i32_7 : i32 to vector<1x64xi32>
    %26 = arith.cmpi sge, %0, %25 : vector<1x64xi32>
    %c64_i32 = arith.constant 64 : i32
    %27 = vector.broadcast %c64_i32 : i32 to vector<1x64xi32>
    %28 = arith.cmpi slt, %0, %27 : vector<1x64xi32>
    %29 = arith.andi %26, %28 : vector<1x64xi1>
    %cst_8 = arith.constant 2.500000e-01 : f32
    %cst_9 = arith.constant 0.000000e+00 : f32
    %30 = vector.broadcast %cst_8 : f32 to vector<1x64xf32>
    %31 = vector.broadcast %cst_9 : f32 to vector<1x64xf32>
    %32 = arith.select %29, %30, %31 : vector<1x64xi1>, vector<1x64xf32>
    %c0 = arith.constant 0 : index
    %c0_10 = arith.constant 0 : index
    %33 = vector.load %arg0[%c0, %c0_10] : memref<16x768xbf16, #tpu.memory_space<vmem>>, vector<16x768xbf16>
    %c0_11 = arith.constant 0 : index
    %c0_12 = arith.constant 0 : index
    %34 = vector.load %arg3[%c0_11, %c0_12] : memref<768x64xbf16, #tpu.memory_space<vmem>>, vector<768x64xbf16>
    %cst_13 = arith.constant dense<0.000000e+00> : vector<16x64xf32>
    %35 = tpu.matmul %33, %34, %cst_13 {dimension_numbers = #tpu.dot_dimension_numbers<[1], [0], [0], [1], [0, 0, 1, 1], [], []>} : vector<16x768xbf16>, vector<768x64xbf16>, vector<16x64xf32> -> vector<16x64xf32>
    %c0_14 = arith.constant 0 : index
    %c0_15 = arith.constant 0 : index
    %36 = vector.load %arg1[%c0_14, %c0_15] : memref<16x64xf32, #tpu.memory_space<vmem>>, vector<16x64xf32>
    %37 = arith.addf %35, %36 : vector<16x64xf32>
    %c0_16 = arith.constant 0 : index
    %c0_17 = arith.constant 0 : index
    %38 = vector.load %arg2[%c0_16, %c0_17] : memref<16x16xf32, #tpu.memory_space<vmem>>, vector<16x16xf32>
    %c0_18 = arith.constant 0 : index
    %c0_19 = arith.constant 0 : index
    %c0_20 = arith.constant 0 : index
    %39 = vector.load %arg9[%c0_18, %c0_19, %c0_20] : memref<2x10x128xf32, #tpu.memory_space<vmem>>, vector<1x10x128xf32>
    %40 = vector.shape_cast %39 : vector<1x10x128xf32> to vector<10x128xf32>
    %41 = vector.extract_strided_slice %40 {offsets = [0, 0], sizes = [1, 64], strides = [1, 1]} : vector<10x128xf32> to vector<1x64xf32>
    %42 = vector.extract_strided_slice %40 {offsets = [1, 0], sizes = [1, 64], strides = [1, 1]} : vector<10x128xf32> to vector<1x64xf32>
    %cst_21 = arith.constant dense<0.000000e+00> : vector<16xf32>
    %43 = vector.multi_reduction <add>, %37, %cst_21 [1] : vector<16x64xf32> to vector<16xf32>
    %44 = vector.shape_cast %43 : vector<16xf32> to vector<16x1xf32>
    %cst_22 = arith.constant 6.400000e+01 : f32
    %45 = vector.broadcast %cst_22 : f32 to vector<16x1xf32>
    %46 = arith.divf %44, %45 : vector<16x1xf32>
    %47 = vector.broadcast %46 : vector<16x1xf32> to vector<16x64xf32>
    %48 = arith.subf %37, %47 : vector<16x64xf32>
    %49 = arith.mulf %48, %48 : vector<16x64xf32>
    %cst_23 = arith.constant dense<0.000000e+00> : vector<16xf32>
    %50 = vector.multi_reduction <add>, %49, %cst_23 [1] : vector<16x64xf32> to vector<16xf32>
    %51 = vector.shape_cast %50 : vector<16xf32> to vector<16x1xf32>
    %cst_24 = arith.constant 6.400000e+01 : f32
    %52 = vector.broadcast %cst_24 : f32 to vector<16x1xf32>
    %53 = arith.divf %51, %52 : vector<16x1xf32>
    %cst_25 = arith.constant 9.99999997E-7 : f32
    %54 = vector.broadcast %cst_25 : f32 to vector<16x1xf32>
    %55 = arith.addf %53, %54 : vector<16x1xf32>
    %56 = math.rsqrt %55 : vector<16x1xf32>
    %57 = vector.broadcast %56 : vector<16x1xf32> to vector<16x64xf32>
    %58 = arith.mulf %48, %57 : vector<16x64xf32>
    %59 = vector.broadcast %41 : vector<1x64xf32> to vector<16x64xf32>
    %60 = arith.mulf %58, %59 : vector<16x64xf32>
    %61 = vector.broadcast %42 : vector<1x64xf32> to vector<16x64xf32>
    %62 = arith.addf %60, %61 : vector<16x64xf32>
    %63 = arith.truncf %62 : vector<16x64xf32> to vector<16x64xbf16>
    %c0_26 = arith.constant 0 : index
    %c0_27 = arith.constant 0 : index
    %c0_28 = arith.constant 0 : index
    %c0_29 = arith.constant 0 : index
    %64 = vector.load %arg4[%c0_26, %c0_27, %c0_28, %c0_29] : memref<2x3x64x64xbf16, #tpu.memory_space<vmem>>, vector<1x1x64x64xbf16>
    %65 = vector.shape_cast %64 : vector<1x1x64x64xbf16> to vector<64x64xbf16>
    %cst_30 = arith.constant dense<0.000000e+00> : vector<16x64xf32>
    %66 = tpu.matmul %63, %65, %cst_30 {dimension_numbers = #tpu.dot_dimension_numbers<[1], [0], [0], [1], [0, 0, 1, 1], [], []>} : vector<16x64xbf16>, vector<64x64xbf16>, vector<16x64xf32> -> vector<16x64xf32>
    %67 = vector.extract_strided_slice %40 {offsets = [2, 0], sizes = [1, 64], strides = [1, 1]} : vector<10x128xf32> to vector<1x64xf32>
    %68 = vector.broadcast %67 : vector<1x64xf32> to vector<16x64xf32>
    %69 = arith.addf %66, %68 : vector<16x64xf32>
    %c0_31 = arith.constant 0 : index
    %c1 = arith.constant 1 : index
    %c0_32 = arith.constant 0 : index
    %c0_33 = arith.constant 0 : index
    %70 = vector.load %arg4[%c0_31, %c1, %c0_32, %c0_33] : memref<2x3x64x64xbf16, #tpu.memory_space<vmem>>, vector<1x1x64x64xbf16>
    %71 = vector.shape_cast %70 : vector<1x1x64x64xbf16> to vector<64x64xbf16>
    %cst_34 = arith.constant dense<0.000000e+00> : vector<16x64xf32>
    %72 = tpu.matmul %63, %71, %cst_34 {dimension_numbers = #tpu.dot_dimension_numbers<[1], [0], [0], [1], [0, 0, 1, 1], [], []>} : vector<16x64xbf16>, vector<64x64xbf16>, vector<16x64xf32> -> vector<16x64xf32>
    %73 = vector.extract_strided_slice %40 {offsets = [3, 0], sizes = [1, 64], strides = [1, 1]} : vector<10x128xf32> to vector<1x64xf32>
    %74 = vector.broadcast %73 : vector<1x64xf32> to vector<16x64xf32>
    %75 = arith.addf %72, %74 : vector<16x64xf32>
    %c0_35 = arith.constant 0 : index
    %c2 = arith.constant 2 : index
    %c0_36 = arith.constant 0 : index
    %c0_37 = arith.constant 0 : index
    %76 = vector.load %arg4[%c0_35, %c2, %c0_36, %c0_37] : memref<2x3x64x64xbf16, #tpu.memory_space<vmem>>, vector<1x1x64x64xbf16>
    %77 = vector.shape_cast %76 : vector<1x1x64x64xbf16> to vector<64x64xbf16>
    %cst_38 = arith.constant dense<0.000000e+00> : vector<16x64xf32>
    %78 = tpu.matmul %63, %77, %cst_38 {dimension_numbers = #tpu.dot_dimension_numbers<[1], [0], [0], [1], [0, 0, 1, 1], [], []>} : vector<16x64xbf16>, vector<64x64xbf16>, vector<16x64xf32> -> vector<16x64xf32>
    %79 = vector.extract_strided_slice %40 {offsets = [4, 0], sizes = [1, 64], strides = [1, 1]} : vector<10x128xf32> to vector<1x64xf32>
    %80 = vector.broadcast %79 : vector<1x64xf32> to vector<16x64xf32>
    %81 = arith.addf %78, %80 : vector<16x64xf32>
    %82 = arith.truncf %75 : vector<16x64xf32> to vector<16x64xbf16>
    %83 = arith.truncf %81 : vector<16x64xf32> to vector<16x64xbf16>
    %cst_39 = arith.constant 0.000000e+00 : f32
    %84 = vector.broadcast %cst_39 : f32 to vector<16x64xf32>
    %85 = vector.broadcast %8 : vector<1x64xf32> to vector<16x64xf32>
    %86 = arith.mulf %69, %85 : vector<16x64xf32>
    %87 = arith.truncf %86 : vector<16x64xf32> to vector<16x64xbf16>
    %cst_40 = arith.constant dense<0.000000e+00> : vector<16x16xf32>
    %88 = tpu.matmul %87, %82, %cst_40 {dimension_numbers = #tpu.dot_dimension_numbers<[1], [1], [0], [0], [0, 0, 1, 0], [], []>} : vector<16x64xbf16>, vector<16x64xbf16>, vector<16x16xf32> -> vector<16x16xf32>
    %89 = arith.addf %88, %38 : vector<16x16xf32>
    %cst_41 = arith.constant dense<0xFF800000> : vector<16xf32>
    %90 = vector.multi_reduction <maximumf>, %89, %cst_41 [1] : vector<16x16xf32> to vector<16xf32>
    %91 = vector.shape_cast %90 : vector<16xf32> to vector<16x1xf32>
    %92 = vector.broadcast %91 : vector<16x1xf32> to vector<16x16xf32>
    %93 = arith.subf %89, %92 : vector<16x16xf32>
    %94 = math.exp %93 : vector<16x16xf32>
    %cst_42 = arith.constant dense<0.000000e+00> : vector<16xf32>
    %95 = vector.multi_reduction <add>, %94, %cst_42 [1] : vector<16x16xf32> to vector<16xf32>
    %96 = vector.shape_cast %95 : vector<16xf32> to vector<16x1xf32>
    %97 = tpu.reciprocal %96 : vector<16x1xf32> -> vector<16x1xf32>
    %98 = vector.broadcast %97 : vector<16x1xf32> to vector<16x16xf32>
    %99 = arith.mulf %94, %98 : vector<16x16xf32>
    %c0_43 = arith.constant 0 : index
    %c0_44 = arith.constant 0 : index
    %c0_45 = arith.constant 0 : index
    %c0_46 = arith.constant 0 : index
    %100 = vector.load %arg5[%c0_43, %c0_44, %c0_45, %c0_46] : memref<2x4x64x64xbf16, #tpu.memory_space<vmem>>, vector<1x1x64x64xbf16>
    %101 = vector.shape_cast %100 : vector<1x1x64x64xbf16> to vector<64x64xbf16>
    %cst_47 = arith.constant dense<0.000000e+00> : vector<16x64xf32>
    %102 = tpu.matmul %83, %101, %cst_47 {dimension_numbers = #tpu.dot_dimension_numbers<[1], [0], [0], [1], [0, 0, 1, 1], [], []>} : vector<16x64xbf16>, vector<64x64xbf16>, vector<16x64xf32> -> vector<16x64xf32>
    %103 = arith.truncf %99 : vector<16x16xf32> to vector<16x16xbf16>
    %104 = arith.truncf %102 : vector<16x64xf32> to vector<16x64xbf16>
    %cst_48 = arith.constant dense<0.000000e+00> : vector<16x64xf32>
    %105 = tpu.matmul %103, %104, %cst_48 {dimension_numbers = #tpu.dot_dimension_numbers<[1], [0], [0], [1], [0, 0, 1, 1], [], []>} : vector<16x16xbf16>, vector<16x64xbf16>, vector<16x64xf32> -> vector<16x64xf32>
    %106 = arith.addf %84, %105 : vector<16x64xf32>
    %107 = vector.broadcast %16 : vector<1x64xf32> to vector<16x64xf32>
    %108 = arith.mulf %69, %107 : vector<16x64xf32>
    %109 = arith.truncf %108 : vector<16x64xf32> to vector<16x64xbf16>
    %cst_49 = arith.constant dense<0.000000e+00> : vector<16x16xf32>
    %110 = tpu.matmul %109, %82, %cst_49 {dimension_numbers = #tpu.dot_dimension_numbers<[1], [1], [0], [0], [0, 0, 1, 0], [], []>} : vector<16x64xbf16>, vector<16x64xbf16>, vector<16x16xf32> -> vector<16x16xf32>
    %111 = arith.addf %110, %38 : vector<16x16xf32>
    %cst_50 = arith.constant dense<0xFF800000> : vector<16xf32>
    %112 = vector.multi_reduction <maximumf>, %111, %cst_50 [1] : vector<16x16xf32> to vector<16xf32>
    %113 = vector.shape_cast %112 : vector<16xf32> to vector<16x1xf32>
    %114 = vector.broadcast %113 : vector<16x1xf32> to vector<16x16xf32>
    %115 = arith.subf %111, %114 : vector<16x16xf32>
    %116 = math.exp %115 : vector<16x16xf32>
    %cst_51 = arith.constant dense<0.000000e+00> : vector<16xf32>
    %117 = vector.multi_reduction <add>, %116, %cst_51 [1] : vector<16x16xf32> to vector<16xf32>
    %118 = vector.shape_cast %117 : vector<16xf32> to vector<16x1xf32>
    %119 = tpu.reciprocal %118 : vector<16x1xf32> -> vector<16x1xf32>
    %120 = vector.broadcast %119 : vector<16x1xf32> to vector<16x16xf32>
    %121 = arith.mulf %116, %120 : vector<16x16xf32>
    %c0_52 = arith.constant 0 : index
    %c1_53 = arith.constant 1 : index
    %c0_54 = arith.constant 0 : index
    %c0_55 = arith.constant 0 : index
    %122 = vector.load %arg5[%c0_52, %c1_53, %c0_54, %c0_55] : memref<2x4x64x64xbf16, #tpu.memory_space<vmem>>, vector<1x1x64x64xbf16>
    %123 = vector.shape_cast %122 : vector<1x1x64x64xbf16> to vector<64x64xbf16>
    %cst_56 = arith.constant dense<0.000000e+00> : vector<16x64xf32>
    %124 = tpu.matmul %83, %123, %cst_56 {dimension_numbers = #tpu.dot_dimension_numbers<[1], [0], [0], [1], [0, 0, 1, 1], [], []>} : vector<16x64xbf16>, vector<64x64xbf16>, vector<16x64xf32> -> vector<16x64xf32>
    %125 = arith.truncf %121 : vector<16x16xf32> to vector<16x16xbf16>
    %126 = arith.truncf %124 : vector<16x64xf32> to vector<16x64xbf16>
    %cst_57 = arith.constant dense<0.000000e+00> : vector<16x64xf32>
    %127 = tpu.matmul %125, %126, %cst_57 {dimension_numbers = #tpu.dot_dimension_numbers<[1], [0], [0], [1], [0, 0, 1, 1], [], []>} : vector<16x16xbf16>, vector<16x64xbf16>, vector<16x64xf32> -> vector<16x64xf32>
    %128 = arith.addf %106, %127 : vector<16x64xf32>
    %129 = vector.broadcast %24 : vector<1x64xf32> to vector<16x64xf32>
    %130 = arith.mulf %69, %129 : vector<16x64xf32>
    %131 = arith.truncf %130 : vector<16x64xf32> to vector<16x64xbf16>
    %cst_58 = arith.constant dense<0.000000e+00> : vector<16x16xf32>
    %132 = tpu.matmul %131, %82, %cst_58 {dimension_numbers = #tpu.dot_dimension_numbers<[1], [1], [0], [0], [0, 0, 1, 0], [], []>} : vector<16x64xbf16>, vector<16x64xbf16>, vector<16x16xf32> -> vector<16x16xf32>
    %133 = arith.addf %132, %38 : vector<16x16xf32>
    %cst_59 = arith.constant dense<0xFF800000> : vector<16xf32>
    %134 = vector.multi_reduction <maximumf>, %133, %cst_59 [1] : vector<16x16xf32> to vector<16xf32>
    %135 = vector.shape_cast %134 : vector<16xf32> to vector<16x1xf32>
    %136 = vector.broadcast %135 : vector<16x1xf32> to vector<16x16xf32>
    %137 = arith.subf %133, %136 : vector<16x16xf32>
    %138 = math.exp %137 : vector<16x16xf32>
    %cst_60 = arith.constant dense<0.000000e+00> : vector<16xf32>
    %139 = vector.multi_reduction <add>, %138, %cst_60 [1] : vector<16x16xf32> to vector<16xf32>
    %140 = vector.shape_cast %139 : vector<16xf32> to vector<16x1xf32>
    %141 = tpu.reciprocal %140 : vector<16x1xf32> -> vector<16x1xf32>
    %142 = vector.broadcast %141 : vector<16x1xf32> to vector<16x16xf32>
    %143 = arith.mulf %138, %142 : vector<16x16xf32>
    %c0_61 = arith.constant 0 : index
    %c2_62 = arith.constant 2 : index
    %c0_63 = arith.constant 0 : index
    %c0_64 = arith.constant 0 : index
    %144 = vector.load %arg5[%c0_61, %c2_62, %c0_63, %c0_64] : memref<2x4x64x64xbf16, #tpu.memory_space<vmem>>, vector<1x1x64x64xbf16>
    %145 = vector.shape_cast %144 : vector<1x1x64x64xbf16> to vector<64x64xbf16>
    %cst_65 = arith.constant dense<0.000000e+00> : vector<16x64xf32>
    %146 = tpu.matmul %83, %145, %cst_65 {dimension_numbers = #tpu.dot_dimension_numbers<[1], [0], [0], [1], [0, 0, 1, 1], [], []>} : vector<16x64xbf16>, vector<64x64xbf16>, vector<16x64xf32> -> vector<16x64xf32>
    %147 = arith.truncf %143 : vector<16x16xf32> to vector<16x16xbf16>
    %148 = arith.truncf %146 : vector<16x64xf32> to vector<16x64xbf16>
    %cst_66 = arith.constant dense<0.000000e+00> : vector<16x64xf32>
    %149 = tpu.matmul %147, %148, %cst_66 {dimension_numbers = #tpu.dot_dimension_numbers<[1], [0], [0], [1], [0, 0, 1, 1], [], []>} : vector<16x16xbf16>, vector<16x64xbf16>, vector<16x64xf32> -> vector<16x64xf32>
    %150 = arith.addf %128, %149 : vector<16x64xf32>
    %151 = vector.broadcast %32 : vector<1x64xf32> to vector<16x64xf32>
    %152 = arith.mulf %69, %151 : vector<16x64xf32>
    %153 = arith.truncf %152 : vector<16x64xf32> to vector<16x64xbf16>
    %cst_67 = arith.constant dense<0.000000e+00> : vector<16x16xf32>
    %154 = tpu.matmul %153, %82, %cst_67 {dimension_numbers = #tpu.dot_dimension_numbers<[1], [1], [0], [0], [0, 0, 1, 0], [], []>} : vector<16x64xbf16>, vector<16x64xbf16>, vector<16x16xf32> -> vector<16x16xf32>
    %155 = arith.addf %154, %38 : vector<16x16xf32>
    %cst_68 = arith.constant dense<0xFF800000> : vector<16xf32>
    %156 = vector.multi_reduction <maximumf>, %155, %cst_68 [1] : vector<16x16xf32> to vector<16xf32>
    %157 = vector.shape_cast %156 : vector<16xf32> to vector<16x1xf32>
    %158 = vector.broadcast %157 : vector<16x1xf32> to vector<16x16xf32>
    %159 = arith.subf %155, %158 : vector<16x16xf32>
    %160 = math.exp %159 : vector<16x16xf32>
    %cst_69 = arith.constant dense<0.000000e+00> : vector<16xf32>
    %161 = vector.multi_reduction <add>, %160, %cst_69 [1] : vector<16x16xf32> to vector<16xf32>
    %162 = vector.shape_cast %161 : vector<16xf32> to vector<16x1xf32>
    %163 = tpu.reciprocal %162 : vector<16x1xf32> -> vector<16x1xf32>
    %164 = vector.broadcast %163 : vector<16x1xf32> to vector<16x16xf32>
    %165 = arith.mulf %160, %164 : vector<16x16xf32>
    %c0_70 = arith.constant 0 : index
    %c3 = arith.constant 3 : index
    %c0_71 = arith.constant 0 : index
    %c0_72 = arith.constant 0 : index
    %166 = vector.load %arg5[%c0_70, %c3, %c0_71, %c0_72] : memref<2x4x64x64xbf16, #tpu.memory_space<vmem>>, vector<1x1x64x64xbf16>
    %167 = vector.shape_cast %166 : vector<1x1x64x64xbf16> to vector<64x64xbf16>
    %cst_73 = arith.constant dense<0.000000e+00> : vector<16x64xf32>
    %168 = tpu.matmul %83, %167, %cst_73 {dimension_numbers = #tpu.dot_dimension_numbers<[1], [0], [0], [1], [0, 0, 1, 1], [], []>} : vector<16x64xbf16>, vector<64x64xbf16>, vector<16x64xf32> -> vector<16x64xf32>
    %169 = arith.truncf %165 : vector<16x16xf32> to vector<16x16xbf16>
    %170 = arith.truncf %168 : vector<16x64xf32> to vector<16x64xbf16>
    %cst_74 = arith.constant dense<0.000000e+00> : vector<16x64xf32>
    %171 = tpu.matmul %169, %170, %cst_74 {dimension_numbers = #tpu.dot_dimension_numbers<[1], [0], [0], [1], [0, 0, 1, 1], [], []>} : vector<16x16xbf16>, vector<16x64xbf16>, vector<16x64xf32> -> vector<16x64xf32>
    %172 = arith.addf %150, %171 : vector<16x64xf32>
    %173 = arith.addf %37, %172 : vector<16x64xf32>
    %174 = vector.extract_strided_slice %40 {offsets = [5, 0], sizes = [1, 64], strides = [1, 1]} : vector<10x128xf32> to vector<1x64xf32>
    %175 = vector.broadcast %174 : vector<1x64xf32> to vector<16x64xf32>
    %176 = arith.addf %173, %175 : vector<16x64xf32>
    %177 = vector.extract_strided_slice %40 {offsets = [6, 0], sizes = [1, 64], strides = [1, 1]} : vector<10x128xf32> to vector<1x64xf32>
    %178 = vector.extract_strided_slice %40 {offsets = [7, 0], sizes = [1, 64], strides = [1, 1]} : vector<10x128xf32> to vector<1x64xf32>
    %cst_75 = arith.constant dense<0.000000e+00> : vector<16xf32>
    %179 = vector.multi_reduction <add>, %176, %cst_75 [1] : vector<16x64xf32> to vector<16xf32>
    %180 = vector.shape_cast %179 : vector<16xf32> to vector<16x1xf32>
    %cst_76 = arith.constant 6.400000e+01 : f32
    %181 = vector.broadcast %cst_76 : f32 to vector<16x1xf32>
    %182 = arith.divf %180, %181 : vector<16x1xf32>
    %183 = vector.broadcast %182 : vector<16x1xf32> to vector<16x64xf32>
    %184 = arith.subf %176, %183 : vector<16x64xf32>
    %185 = arith.mulf %184, %184 : vector<16x64xf32>
    %cst_77 = arith.constant dense<0.000000e+00> : vector<16xf32>
    %186 = vector.multi_reduction <add>, %185, %cst_77 [1] : vector<16x64xf32> to vector<16xf32>
    %187 = vector.shape_cast %186 : vector<16xf32> to vector<16x1xf32>
    %cst_78 = arith.constant 6.400000e+01 : f32
    %188 = vector.broadcast %cst_78 : f32 to vector<16x1xf32>
    %189 = arith.divf %187, %188 : vector<16x1xf32>
    %cst_79 = arith.constant 9.99999997E-7 : f32
    %190 = vector.broadcast %cst_79 : f32 to vector<16x1xf32>
    %191 = arith.addf %189, %190 : vector<16x1xf32>
    %192 = math.rsqrt %191 : vector<16x1xf32>
    %193 = vector.broadcast %192 : vector<16x1xf32> to vector<16x64xf32>
    %194 = arith.mulf %184, %193 : vector<16x64xf32>
    %195 = vector.broadcast %177 : vector<1x64xf32> to vector<16x64xf32>
    %196 = arith.mulf %194, %195 : vector<16x64xf32>
    %197 = vector.broadcast %178 : vector<1x64xf32> to vector<16x64xf32>
    %198 = arith.addf %196, %197 : vector<16x64xf32>
    %199 = arith.truncf %198 : vector<16x64xf32> to vector<16x64xbf16>
    %c0_80 = arith.constant 0 : index
    %c0_81 = arith.constant 0 : index
    %c0_82 = arith.constant 0 : index
    %200 = vector.load %arg6[%c0_80, %c0_81, %c0_82] : memref<2x64x128xbf16, #tpu.memory_space<vmem>>, vector<1x64x128xbf16>
    %201 = vector.shape_cast %200 : vector<1x64x128xbf16> to vector<64x128xbf16>
    %cst_83 = arith.constant dense<0.000000e+00> : vector<16x128xf32>
    %202 = tpu.matmul %199, %201, %cst_83 {dimension_numbers = #tpu.dot_dimension_numbers<[1], [0], [0], [1], [0, 0, 1, 1], [], []>} : vector<16x64xbf16>, vector<64x128xbf16>, vector<16x128xf32> -> vector<16x128xf32>
    %203 = vector.extract_strided_slice %40 {offsets = [8, 0], sizes = [1, 128], strides = [1, 1]} : vector<10x128xf32> to vector<1x128xf32>
    %204 = vector.broadcast %203 : vector<1x128xf32> to vector<16x128xf32>
    %205 = arith.addf %202, %204 : vector<16x128xf32>
    %cst_84 = arith.constant 5.000000e-01 : f32
    %206 = vector.broadcast %cst_84 : f32 to vector<16x128xf32>
    %207 = arith.mulf %206, %205 : vector<16x128xf32>
    %cst_85 = arith.constant 4.471500e-02 : f32
    %208 = vector.broadcast %cst_85 : f32 to vector<16x128xf32>
    %209 = arith.mulf %208, %205 : vector<16x128xf32>
    %210 = arith.mulf %209, %205 : vector<16x128xf32>
    %211 = arith.mulf %210, %205 : vector<16x128xf32>
    %212 = arith.addf %205, %211 : vector<16x128xf32>
    %cst_86 = arith.constant 0.797884583 : f32
    %213 = vector.broadcast %cst_86 : f32 to vector<16x128xf32>
    %214 = arith.mulf %213, %212 : vector<16x128xf32>
    %215 = math.tanh %214 : vector<16x128xf32>
    %cst_87 = arith.constant 1.000000e+00 : f32
    %216 = vector.broadcast %cst_87 : f32 to vector<16x128xf32>
    %217 = arith.addf %216, %215 : vector<16x128xf32>
    %218 = arith.mulf %207, %217 : vector<16x128xf32>
    %219 = arith.truncf %218 : vector<16x128xf32> to vector<16x128xbf16>
    %c0_88 = arith.constant 0 : index
    %c0_89 = arith.constant 0 : index
    %c0_90 = arith.constant 0 : index
    %220 = vector.load %arg7[%c0_88, %c0_89, %c0_90] : memref<2x128x64xbf16, #tpu.memory_space<vmem>>, vector<1x128x64xbf16>
    %221 = vector.shape_cast %220 : vector<1x128x64xbf16> to vector<128x64xbf16>
    %cst_91 = arith.constant dense<0.000000e+00> : vector<16x64xf32>
    %222 = tpu.matmul %219, %221, %cst_91 {dimension_numbers = #tpu.dot_dimension_numbers<[1], [0], [0], [1], [0, 0, 1, 1], [], []>} : vector<16x128xbf16>, vector<128x64xbf16>, vector<16x64xf32> -> vector<16x64xf32>
    %223 = vector.extract_strided_slice %40 {offsets = [9, 0], sizes = [1, 64], strides = [1, 1]} : vector<10x128xf32> to vector<1x64xf32>
    %224 = vector.broadcast %223 : vector<1x64xf32> to vector<16x64xf32>
    %225 = arith.addf %222, %224 : vector<16x64xf32>
    %226 = arith.addf %176, %225 : vector<16x64xf32>
    %c1_92 = arith.constant 1 : index
    %c0_93 = arith.constant 0 : index
    %c0_94 = arith.constant 0 : index
    %227 = vector.load %arg9[%c1_92, %c0_93, %c0_94] : memref<2x10x128xf32, #tpu.memory_space<vmem>>, vector<1x10x128xf32>
    %228 = vector.shape_cast %227 : vector<1x10x128xf32> to vector<10x128xf32>
    %229 = vector.extract_strided_slice %228 {offsets = [0, 0], sizes = [1, 64], strides = [1, 1]} : vector<10x128xf32> to vector<1x64xf32>
    %230 = vector.extract_strided_slice %228 {offsets = [1, 0], sizes = [1, 64], strides = [1, 1]} : vector<10x128xf32> to vector<1x64xf32>
    %cst_95 = arith.constant dense<0.000000e+00> : vector<16xf32>
    %231 = vector.multi_reduction <add>, %226, %cst_95 [1] : vector<16x64xf32> to vector<16xf32>
    %232 = vector.shape_cast %231 : vector<16xf32> to vector<16x1xf32>
    %cst_96 = arith.constant 6.400000e+01 : f32
    %233 = vector.broadcast %cst_96 : f32 to vector<16x1xf32>
    %234 = arith.divf %232, %233 : vector<16x1xf32>
    %235 = vector.broadcast %234 : vector<16x1xf32> to vector<16x64xf32>
    %236 = arith.subf %226, %235 : vector<16x64xf32>
    %237 = arith.mulf %236, %236 : vector<16x64xf32>
    %cst_97 = arith.constant dense<0.000000e+00> : vector<16xf32>
    %238 = vector.multi_reduction <add>, %237, %cst_97 [1] : vector<16x64xf32> to vector<16xf32>
    %239 = vector.shape_cast %238 : vector<16xf32> to vector<16x1xf32>
    %cst_98 = arith.constant 6.400000e+01 : f32
    %240 = vector.broadcast %cst_98 : f32 to vector<16x1xf32>
    %241 = arith.divf %239, %240 : vector<16x1xf32>
    %cst_99 = arith.constant 9.99999997E-7 : f32
    %242 = vector.broadcast %cst_99 : f32 to vector<16x1xf32>
    %243 = arith.addf %241, %242 : vector<16x1xf32>
    %244 = math.rsqrt %243 : vector<16x1xf32>
    %245 = vector.broadcast %244 : vector<16x1xf32> to vector<16x64xf32>
    %246 = arith.mulf %236, %245 : vector<16x64xf32>
    %247 = vector.broadcast %229 : vector<1x64xf32> to vector<16x64xf32>
    %248 = arith.mulf %246, %247 : vector<16x64xf32>
    %249 = vector.broadcast %230 : vector<1x64xf32> to vector<16x64xf32>
    %250 = arith.addf %248, %249 : vector<16x64xf32>
    %251 = arith.truncf %250 : vector<16x64xf32> to vector<16x64xbf16>
    %c1_100 = arith.constant 1 : index
    %c0_101 = arith.constant 0 : index
    %c0_102 = arith.constant 0 : index
    %c0_103 = arith.constant 0 : index
    %252 = vector.load %arg4[%c1_100, %c0_101, %c0_102, %c0_103] : memref<2x3x64x64xbf16, #tpu.memory_space<vmem>>, vector<1x1x64x64xbf16>
    %253 = vector.shape_cast %252 : vector<1x1x64x64xbf16> to vector<64x64xbf16>
    %cst_104 = arith.constant dense<0.000000e+00> : vector<16x64xf32>
    %254 = tpu.matmul %251, %253, %cst_104 {dimension_numbers = #tpu.dot_dimension_numbers<[1], [0], [0], [1], [0, 0, 1, 1], [], []>} : vector<16x64xbf16>, vector<64x64xbf16>, vector<16x64xf32> -> vector<16x64xf32>
    %255 = vector.extract_strided_slice %228 {offsets = [2, 0], sizes = [1, 64], strides = [1, 1]} : vector<10x128xf32> to vector<1x64xf32>
    %256 = vector.broadcast %255 : vector<1x64xf32> to vector<16x64xf32>
    %257 = arith.addf %254, %256 : vector<16x64xf32>
    %c1_105 = arith.constant 1 : index
    %c1_106 = arith.constant 1 : index
    %c0_107 = arith.constant 0 : index
    %c0_108 = arith.constant 0 : index
    %258 = vector.load %arg4[%c1_105, %c1_106, %c0_107, %c0_108] : memref<2x3x64x64xbf16, #tpu.memory_space<vmem>>, vector<1x1x64x64xbf16>
    %259 = vector.shape_cast %258 : vector<1x1x64x64xbf16> to vector<64x64xbf16>
    %cst_109 = arith.constant dense<0.000000e+00> : vector<16x64xf32>
    %260 = tpu.matmul %251, %259, %cst_109 {dimension_numbers = #tpu.dot_dimension_numbers<[1], [0], [0], [1], [0, 0, 1, 1], [], []>} : vector<16x64xbf16>, vector<64x64xbf16>, vector<16x64xf32> -> vector<16x64xf32>
    %261 = vector.extract_strided_slice %228 {offsets = [3, 0], sizes = [1, 64], strides = [1, 1]} : vector<10x128xf32> to vector<1x64xf32>
    %262 = vector.broadcast %261 : vector<1x64xf32> to vector<16x64xf32>
    %263 = arith.addf %260, %262 : vector<16x64xf32>
    %c1_110 = arith.constant 1 : index
    %c2_111 = arith.constant 2 : index
    %c0_112 = arith.constant 0 : index
    %c0_113 = arith.constant 0 : index
    %264 = vector.load %arg4[%c1_110, %c2_111, %c0_112, %c0_113] : memref<2x3x64x64xbf16, #tpu.memory_space<vmem>>, vector<1x1x64x64xbf16>
    %265 = vector.shape_cast %264 : vector<1x1x64x64xbf16> to vector<64x64xbf16>
    %cst_114 = arith.constant dense<0.000000e+00> : vector<16x64xf32>
    %266 = tpu.matmul %251, %265, %cst_114 {dimension_numbers = #tpu.dot_dimension_numbers<[1], [0], [0], [1], [0, 0, 1, 1], [], []>} : vector<16x64xbf16>, vector<64x64xbf16>, vector<16x64xf32> -> vector<16x64xf32>
    %267 = vector.extract_strided_slice %228 {offsets = [4, 0], sizes = [1, 64], strides = [1, 1]} : vector<10x128xf32> to vector<1x64xf32>
    %268 = vector.broadcast %267 : vector<1x64xf32> to vector<16x64xf32>
    %269 = arith.addf %266, %268 : vector<16x64xf32>
    %270 = arith.truncf %263 : vector<16x64xf32> to vector<16x64xbf16>
    %271 = arith.truncf %269 : vector<16x64xf32> to vector<16x64xbf16>
    %cst_115 = arith.constant 0.000000e+00 : f32
    %272 = vector.broadcast %cst_115 : f32 to vector<16x64xf32>
    %273 = vector.broadcast %8 : vector<1x64xf32> to vector<16x64xf32>
    %274 = arith.mulf %257, %273 : vector<16x64xf32>
    %275 = arith.truncf %274 : vector<16x64xf32> to vector<16x64xbf16>
    %cst_116 = arith.constant dense<0.000000e+00> : vector<16x16xf32>
    %276 = tpu.matmul %275, %270, %cst_116 {dimension_numbers = #tpu.dot_dimension_numbers<[1], [1], [0], [0], [0, 0, 1, 0], [], []>} : vector<16x64xbf16>, vector<16x64xbf16>, vector<16x16xf32> -> vector<16x16xf32>
    %277 = arith.addf %276, %38 : vector<16x16xf32>
    %cst_117 = arith.constant dense<0xFF800000> : vector<16xf32>
    %278 = vector.multi_reduction <maximumf>, %277, %cst_117 [1] : vector<16x16xf32> to vector<16xf32>
    %279 = vector.shape_cast %278 : vector<16xf32> to vector<16x1xf32>
    %280 = vector.broadcast %279 : vector<16x1xf32> to vector<16x16xf32>
    %281 = arith.subf %277, %280 : vector<16x16xf32>
    %282 = math.exp %281 : vector<16x16xf32>
    %cst_118 = arith.constant dense<0.000000e+00> : vector<16xf32>
    %283 = vector.multi_reduction <add>, %282, %cst_118 [1] : vector<16x16xf32> to vector<16xf32>
    %284 = vector.shape_cast %283 : vector<16xf32> to vector<16x1xf32>
    %285 = tpu.reciprocal %284 : vector<16x1xf32> -> vector<16x1xf32>
    %286 = vector.broadcast %285 : vector<16x1xf32> to vector<16x16xf32>
    %287 = arith.mulf %282, %286 : vector<16x16xf32>
    %c1_119 = arith.constant 1 : index
    %c0_120 = arith.constant 0 : index
    %c0_121 = arith.constant 0 : index
    %c0_122 = arith.constant 0 : index
    %288 = vector.load %arg5[%c1_119, %c0_120, %c0_121, %c0_122] : memref<2x4x64x64xbf16, #tpu.memory_space<vmem>>, vector<1x1x64x64xbf16>
    %289 = vector.shape_cast %288 : vector<1x1x64x64xbf16> to vector<64x64xbf16>
    %cst_123 = arith.constant dense<0.000000e+00> : vector<16x64xf32>
    %290 = tpu.matmul %271, %289, %cst_123 {dimension_numbers = #tpu.dot_dimension_numbers<[1], [0], [0], [1], [0, 0, 1, 1], [], []>} : vector<16x64xbf16>, vector<64x64xbf16>, vector<16x64xf32> -> vector<16x64xf32>
    %291 = arith.truncf %287 : vector<16x16xf32> to vector<16x16xbf16>
    %292 = arith.truncf %290 : vector<16x64xf32> to vector<16x64xbf16>
    %cst_124 = arith.constant dense<0.000000e+00> : vector<16x64xf32>
    %293 = tpu.matmul %291, %292, %cst_124 {dimension_numbers = #tpu.dot_dimension_numbers<[1], [0], [0], [1], [0, 0, 1, 1], [], []>} : vector<16x16xbf16>, vector<16x64xbf16>, vector<16x64xf32> -> vector<16x64xf32>
    %294 = arith.addf %272, %293 : vector<16x64xf32>
    %295 = vector.broadcast %16 : vector<1x64xf32> to vector<16x64xf32>
    %296 = arith.mulf %257, %295 : vector<16x64xf32>
    %297 = arith.truncf %296 : vector<16x64xf32> to vector<16x64xbf16>
    %cst_125 = arith.constant dense<0.000000e+00> : vector<16x16xf32>
    %298 = tpu.matmul %297, %270, %cst_125 {dimension_numbers = #tpu.dot_dimension_numbers<[1], [1], [0], [0], [0, 0, 1, 0], [], []>} : vector<16x64xbf16>, vector<16x64xbf16>, vector<16x16xf32> -> vector<16x16xf32>
    %299 = arith.addf %298, %38 : vector<16x16xf32>
    %cst_126 = arith.constant dense<0xFF800000> : vector<16xf32>
    %300 = vector.multi_reduction <maximumf>, %299, %cst_126 [1] : vector<16x16xf32> to vector<16xf32>
    %301 = vector.shape_cast %300 : vector<16xf32> to vector<16x1xf32>
    %302 = vector.broadcast %301 : vector<16x1xf32> to vector<16x16xf32>
    %303 = arith.subf %299, %302 : vector<16x16xf32>
    %304 = math.exp %303 : vector<16x16xf32>
    %cst_127 = arith.constant dense<0.000000e+00> : vector<16xf32>
    %305 = vector.multi_reduction <add>, %304, %cst_127 [1] : vector<16x16xf32> to vector<16xf32>
    %306 = vector.shape_cast %305 : vector<16xf32> to vector<16x1xf32>
    %307 = tpu.reciprocal %306 : vector<16x1xf32> -> vector<16x1xf32>
    %308 = vector.broadcast %307 : vector<16x1xf32> to vector<16x16xf32>
    %309 = arith.mulf %304, %308 : vector<16x16xf32>
    %c1_128 = arith.constant 1 : index
    %c1_129 = arith.constant 1 : index
    %c0_130 = arith.constant 0 : index
    %c0_131 = arith.constant 0 : index
    %310 = vector.load %arg5[%c1_128, %c1_129, %c0_130, %c0_131] : memref<2x4x64x64xbf16, #tpu.memory_space<vmem>>, vector<1x1x64x64xbf16>
    %311 = vector.shape_cast %310 : vector<1x1x64x64xbf16> to vector<64x64xbf16>
    %cst_132 = arith.constant dense<0.000000e+00> : vector<16x64xf32>
    %312 = tpu.matmul %271, %311, %cst_132 {dimension_numbers = #tpu.dot_dimension_numbers<[1], [0], [0], [1], [0, 0, 1, 1], [], []>} : vector<16x64xbf16>, vector<64x64xbf16>, vector<16x64xf32> -> vector<16x64xf32>
    %313 = arith.truncf %309 : vector<16x16xf32> to vector<16x16xbf16>
    %314 = arith.truncf %312 : vector<16x64xf32> to vector<16x64xbf16>
    %cst_133 = arith.constant dense<0.000000e+00> : vector<16x64xf32>
    %315 = tpu.matmul %313, %314, %cst_133 {dimension_numbers = #tpu.dot_dimension_numbers<[1], [0], [0], [1], [0, 0, 1, 1], [], []>} : vector<16x16xbf16>, vector<16x64xbf16>, vector<16x64xf32> -> vector<16x64xf32>
    %316 = arith.addf %294, %315 : vector<16x64xf32>
    %317 = vector.broadcast %24 : vector<1x64xf32> to vector<16x64xf32>
    %318 = arith.mulf %257, %317 : vector<16x64xf32>
    %319 = arith.truncf %318 : vector<16x64xf32> to vector<16x64xbf16>
    %cst_134 = arith.constant dense<0.000000e+00> : vector<16x16xf32>
    %320 = tpu.matmul %319, %270, %cst_134 {dimension_numbers = #tpu.dot_dimension_numbers<[1], [1], [0], [0], [0, 0, 1, 0], [], []>} : vector<16x64xbf16>, vector<16x64xbf16>, vector<16x16xf32> -> vector<16x16xf32>
    %321 = arith.addf %320, %38 : vector<16x16xf32>
    %cst_135 = arith.constant dense<0xFF800000> : vector<16xf32>
    %322 = vector.multi_reduction <maximumf>, %321, %cst_135 [1] : vector<16x16xf32> to vector<16xf32>
    %323 = vector.shape_cast %322 : vector<16xf32> to vector<16x1xf32>
    %324 = vector.broadcast %323 : vector<16x1xf32> to vector<16x16xf32>
    %325 = arith.subf %321, %324 : vector<16x16xf32>
    %326 = math.exp %325 : vector<16x16xf32>
    %cst_136 = arith.constant dense<0.000000e+00> : vector<16xf32>
    %327 = vector.multi_reduction <add>, %326, %cst_136 [1] : vector<16x16xf32> to vector<16xf32>
    %328 = vector.shape_cast %327 : vector<16xf32> to vector<16x1xf32>
    %329 = tpu.reciprocal %328 : vector<16x1xf32> -> vector<16x1xf32>
    %330 = vector.broadcast %329 : vector<16x1xf32> to vector<16x16xf32>
    %331 = arith.mulf %326, %330 : vector<16x16xf32>
    %c1_137 = arith.constant 1 : index
    %c2_138 = arith.constant 2 : index
    %c0_139 = arith.constant 0 : index
    %c0_140 = arith.constant 0 : index
    %332 = vector.load %arg5[%c1_137, %c2_138, %c0_139, %c0_140] : memref<2x4x64x64xbf16, #tpu.memory_space<vmem>>, vector<1x1x64x64xbf16>
    %333 = vector.shape_cast %332 : vector<1x1x64x64xbf16> to vector<64x64xbf16>
    %cst_141 = arith.constant dense<0.000000e+00> : vector<16x64xf32>
    %334 = tpu.matmul %271, %333, %cst_141 {dimension_numbers = #tpu.dot_dimension_numbers<[1], [0], [0], [1], [0, 0, 1, 1], [], []>} : vector<16x64xbf16>, vector<64x64xbf16>, vector<16x64xf32> -> vector<16x64xf32>
    %335 = arith.truncf %331 : vector<16x16xf32> to vector<16x16xbf16>
    %336 = arith.truncf %334 : vector<16x64xf32> to vector<16x64xbf16>
    %cst_142 = arith.constant dense<0.000000e+00> : vector<16x64xf32>
    %337 = tpu.matmul %335, %336, %cst_142 {dimension_numbers = #tpu.dot_dimension_numbers<[1], [0], [0], [1], [0, 0, 1, 1], [], []>} : vector<16x16xbf16>, vector<16x64xbf16>, vector<16x64xf32> -> vector<16x64xf32>
    %338 = arith.addf %316, %337 : vector<16x64xf32>
    %339 = vector.broadcast %32 : vector<1x64xf32> to vector<16x64xf32>
    %340 = arith.mulf %257, %339 : vector<16x64xf32>
    %341 = arith.truncf %340 : vector<16x64xf32> to vector<16x64xbf16>
    %cst_143 = arith.constant dense<0.000000e+00> : vector<16x16xf32>
    %342 = tpu.matmul %341, %270, %cst_143 {dimension_numbers = #tpu.dot_dimension_numbers<[1], [1], [0], [0], [0, 0, 1, 0], [], []>} : vector<16x64xbf16>, vector<16x64xbf16>, vector<16x16xf32> -> vector<16x16xf32>
    %343 = arith.addf %342, %38 : vector<16x16xf32>
    %cst_144 = arith.constant dense<0xFF800000> : vector<16xf32>
    %344 = vector.multi_reduction <maximumf>, %343, %cst_144 [1] : vector<16x16xf32> to vector<16xf32>
    %345 = vector.shape_cast %344 : vector<16xf32> to vector<16x1xf32>
    %346 = vector.broadcast %345 : vector<16x1xf32> to vector<16x16xf32>
    %347 = arith.subf %343, %346 : vector<16x16xf32>
    %348 = math.exp %347 : vector<16x16xf32>
    %cst_145 = arith.constant dense<0.000000e+00> : vector<16xf32>
    %349 = vector.multi_reduction <add>, %348, %cst_145 [1] : vector<16x16xf32> to vector<16xf32>
    %350 = vector.shape_cast %349 : vector<16xf32> to vector<16x1xf32>
    %351 = tpu.reciprocal %350 : vector<16x1xf32> -> vector<16x1xf32>
    %352 = vector.broadcast %351 : vector<16x1xf32> to vector<16x16xf32>
    %353 = arith.mulf %348, %352 : vector<16x16xf32>
    %c1_146 = arith.constant 1 : index
    %c3_147 = arith.constant 3 : index
    %c0_148 = arith.constant 0 : index
    %c0_149 = arith.constant 0 : index
    %354 = vector.load %arg5[%c1_146, %c3_147, %c0_148, %c0_149] : memref<2x4x64x64xbf16, #tpu.memory_space<vmem>>, vector<1x1x64x64xbf16>
    %355 = vector.shape_cast %354 : vector<1x1x64x64xbf16> to vector<64x64xbf16>
    %cst_150 = arith.constant dense<0.000000e+00> : vector<16x64xf32>
    %356 = tpu.matmul %271, %355, %cst_150 {dimension_numbers = #tpu.dot_dimension_numbers<[1], [0], [0], [1], [0, 0, 1, 1], [], []>} : vector<16x64xbf16>, vector<64x64xbf16>, vector<16x64xf32> -> vector<16x64xf32>
    %357 = arith.truncf %353 : vector<16x16xf32> to vector<16x16xbf16>
    %358 = arith.truncf %356 : vector<16x64xf32> to vector<16x64xbf16>
    %cst_151 = arith.constant dense<0.000000e+00> : vector<16x64xf32>
    %359 = tpu.matmul %357, %358, %cst_151 {dimension_numbers = #tpu.dot_dimension_numbers<[1], [0], [0], [1], [0, 0, 1, 1], [], []>} : vector<16x16xbf16>, vector<16x64xbf16>, vector<16x64xf32> -> vector<16x64xf32>
    %360 = arith.addf %338, %359 : vector<16x64xf32>
    %361 = arith.addf %226, %360 : vector<16x64xf32>
    %362 = vector.extract_strided_slice %228 {offsets = [5, 0], sizes = [1, 64], strides = [1, 1]} : vector<10x128xf32> to vector<1x64xf32>
    %363 = vector.broadcast %362 : vector<1x64xf32> to vector<16x64xf32>
    %364 = arith.addf %361, %363 : vector<16x64xf32>
    %365 = vector.extract_strided_slice %228 {offsets = [6, 0], sizes = [1, 64], strides = [1, 1]} : vector<10x128xf32> to vector<1x64xf32>
    %366 = vector.extract_strided_slice %228 {offsets = [7, 0], sizes = [1, 64], strides = [1, 1]} : vector<10x128xf32> to vector<1x64xf32>
    %cst_152 = arith.constant dense<0.000000e+00> : vector<16xf32>
    %367 = vector.multi_reduction <add>, %364, %cst_152 [1] : vector<16x64xf32> to vector<16xf32>
    %368 = vector.shape_cast %367 : vector<16xf32> to vector<16x1xf32>
    %cst_153 = arith.constant 6.400000e+01 : f32
    %369 = vector.broadcast %cst_153 : f32 to vector<16x1xf32>
    %370 = arith.divf %368, %369 : vector<16x1xf32>
    %371 = vector.broadcast %370 : vector<16x1xf32> to vector<16x64xf32>
    %372 = arith.subf %364, %371 : vector<16x64xf32>
    %373 = arith.mulf %372, %372 : vector<16x64xf32>
    %cst_154 = arith.constant dense<0.000000e+00> : vector<16xf32>
    %374 = vector.multi_reduction <add>, %373, %cst_154 [1] : vector<16x64xf32> to vector<16xf32>
    %375 = vector.shape_cast %374 : vector<16xf32> to vector<16x1xf32>
    %cst_155 = arith.constant 6.400000e+01 : f32
    %376 = vector.broadcast %cst_155 : f32 to vector<16x1xf32>
    %377 = arith.divf %375, %376 : vector<16x1xf32>
    %cst_156 = arith.constant 9.99999997E-7 : f32
    %378 = vector.broadcast %cst_156 : f32 to vector<16x1xf32>
    %379 = arith.addf %377, %378 : vector<16x1xf32>
    %380 = math.rsqrt %379 : vector<16x1xf32>
    %381 = vector.broadcast %380 : vector<16x1xf32> to vector<16x64xf32>
    %382 = arith.mulf %372, %381 : vector<16x64xf32>
    %383 = vector.broadcast %365 : vector<1x64xf32> to vector<16x64xf32>
    %384 = arith.mulf %382, %383 : vector<16x64xf32>
    %385 = vector.broadcast %366 : vector<1x64xf32> to vector<16x64xf32>
    %386 = arith.addf %384, %385 : vector<16x64xf32>
    %387 = arith.truncf %386 : vector<16x64xf32> to vector<16x64xbf16>
    %c1_157 = arith.constant 1 : index
    %c0_158 = arith.constant 0 : index
    %c0_159 = arith.constant 0 : index
    %388 = vector.load %arg6[%c1_157, %c0_158, %c0_159] : memref<2x64x128xbf16, #tpu.memory_space<vmem>>, vector<1x64x128xbf16>
    %389 = vector.shape_cast %388 : vector<1x64x128xbf16> to vector<64x128xbf16>
    %cst_160 = arith.constant dense<0.000000e+00> : vector<16x128xf32>
    %390 = tpu.matmul %387, %389, %cst_160 {dimension_numbers = #tpu.dot_dimension_numbers<[1], [0], [0], [1], [0, 0, 1, 1], [], []>} : vector<16x64xbf16>, vector<64x128xbf16>, vector<16x128xf32> -> vector<16x128xf32>
    %391 = vector.extract_strided_slice %228 {offsets = [8, 0], sizes = [1, 128], strides = [1, 1]} : vector<10x128xf32> to vector<1x128xf32>
    %392 = vector.broadcast %391 : vector<1x128xf32> to vector<16x128xf32>
    %393 = arith.addf %390, %392 : vector<16x128xf32>
    %cst_161 = arith.constant 5.000000e-01 : f32
    %394 = vector.broadcast %cst_161 : f32 to vector<16x128xf32>
    %395 = arith.mulf %394, %393 : vector<16x128xf32>
    %cst_162 = arith.constant 4.471500e-02 : f32
    %396 = vector.broadcast %cst_162 : f32 to vector<16x128xf32>
    %397 = arith.mulf %396, %393 : vector<16x128xf32>
    %398 = arith.mulf %397, %393 : vector<16x128xf32>
    %399 = arith.mulf %398, %393 : vector<16x128xf32>
    %400 = arith.addf %393, %399 : vector<16x128xf32>
    %cst_163 = arith.constant 0.797884583 : f32
    %401 = vector.broadcast %cst_163 : f32 to vector<16x128xf32>
    %402 = arith.mulf %401, %400 : vector<16x128xf32>
    %403 = math.tanh %402 : vector<16x128xf32>
    %cst_164 = arith.constant 1.000000e+00 : f32
    %404 = vector.broadcast %cst_164 : f32 to vector<16x128xf32>
    %405 = arith.addf %404, %403 : vector<16x128xf32>
    %406 = arith.mulf %395, %405 : vector<16x128xf32>
    %407 = arith.truncf %406 : vector<16x128xf32> to vector<16x128xbf16>
    %c1_165 = arith.constant 1 : index
    %c0_166 = arith.constant 0 : index
    %c0_167 = arith.constant 0 : index
    %408 = vector.load %arg7[%c1_165, %c0_166, %c0_167] : memref<2x128x64xbf16, #tpu.memory_space<vmem>>, vector<1x128x64xbf16>
    %409 = vector.shape_cast %408 : vector<1x128x64xbf16> to vector<128x64xbf16>
    %cst_168 = arith.constant dense<0.000000e+00> : vector<16x64xf32>
    %410 = tpu.matmul %407, %409, %cst_168 {dimension_numbers = #tpu.dot_dimension_numbers<[1], [0], [0], [1], [0, 0, 1, 1], [], []>} : vector<16x128xbf16>, vector<128x64xbf16>, vector<16x64xf32> -> vector<16x64xf32>
    %411 = vector.extract_strided_slice %228 {offsets = [9, 0], sizes = [1, 64], strides = [1, 1]} : vector<10x128xf32> to vector<1x64xf32>
    %412 = vector.broadcast %411 : vector<1x64xf32> to vector<16x64xf32>
    %413 = arith.addf %410, %412 : vector<16x64xf32>
    %414 = arith.addf %364, %413 : vector<16x64xf32>
    %c0_169 = arith.constant 0 : index
    %c0_170 = arith.constant 0 : index
    %415 = vector.load %arg10[%c0_169, %c0_170] : memref<3x128xf32, #tpu.memory_space<vmem>>, vector<3x128xf32>
    %416 = vector.extract_strided_slice %415 {offsets = [0, 0], sizes = [1, 64], strides = [1, 1]} : vector<3x128xf32> to vector<1x64xf32>
    %417 = vector.extract_strided_slice %415 {offsets = [1, 0], sizes = [1, 64], strides = [1, 1]} : vector<3x128xf32> to vector<1x64xf32>
    %cst_171 = arith.constant dense<0.000000e+00> : vector<16xf32>
    %418 = vector.multi_reduction <add>, %414, %cst_171 [1] : vector<16x64xf32> to vector<16xf32>
    %419 = vector.shape_cast %418 : vector<16xf32> to vector<16x1xf32>
    %cst_172 = arith.constant 6.400000e+01 : f32
    %420 = vector.broadcast %cst_172 : f32 to vector<16x1xf32>
    %421 = arith.divf %419, %420 : vector<16x1xf32>
    %422 = vector.broadcast %421 : vector<16x1xf32> to vector<16x64xf32>
    %423 = arith.subf %414, %422 : vector<16x64xf32>
    %424 = arith.mulf %423, %423 : vector<16x64xf32>
    %cst_173 = arith.constant dense<0.000000e+00> : vector<16xf32>
    %425 = vector.multi_reduction <add>, %424, %cst_173 [1] : vector<16x64xf32> to vector<16xf32>
    %426 = vector.shape_cast %425 : vector<16xf32> to vector<16x1xf32>
    %cst_174 = arith.constant 6.400000e+01 : f32
    %427 = vector.broadcast %cst_174 : f32 to vector<16x1xf32>
    %428 = arith.divf %426, %427 : vector<16x1xf32>
    %cst_175 = arith.constant 9.99999997E-7 : f32
    %429 = vector.broadcast %cst_175 : f32 to vector<16x1xf32>
    %430 = arith.addf %428, %429 : vector<16x1xf32>
    %431 = math.rsqrt %430 : vector<16x1xf32>
    %432 = vector.broadcast %431 : vector<16x1xf32> to vector<16x64xf32>
    %433 = arith.mulf %423, %432 : vector<16x64xf32>
    %434 = vector.broadcast %416 : vector<1x64xf32> to vector<16x64xf32>
    %435 = arith.mulf %433, %434 : vector<16x64xf32>
    %436 = vector.broadcast %417 : vector<1x64xf32> to vector<16x64xf32>
    %437 = arith.addf %435, %436 : vector<16x64xf32>
    %438 = arith.truncf %437 : vector<16x64xf32> to vector<16x64xbf16>
    %c0_176 = arith.constant 0 : index
    %c0_177 = arith.constant 0 : index
    %439 = vector.load %arg8[%c0_176, %c0_177] : memref<64x128xbf16, #tpu.memory_space<vmem>>, vector<64x128xbf16>
    %cst_178 = arith.constant dense<0.000000e+00> : vector<16x128xf32>
    %440 = tpu.matmul %438, %439, %cst_178 {dimension_numbers = #tpu.dot_dimension_numbers<[1], [0], [0], [1], [0, 0, 1, 1], [], []>} : vector<16x64xbf16>, vector<64x128xbf16>, vector<16x128xf32> -> vector<16x128xf32>
    %441 = vector.extract_strided_slice %415 {offsets = [2, 0], sizes = [1, 128], strides = [1, 1]} : vector<3x128xf32> to vector<1x128xf32>
    %442 = vector.broadcast %441 : vector<1x128xf32> to vector<16x128xf32>
    %443 = arith.addf %440, %442 : vector<16x128xf32>
    %c0_179 = arith.constant 0 : index
    %c0_180 = arith.constant 0 : index
    %444 = vector.load %arg11[%c0_179, %c0_180] : memref<16x128xf32, #tpu.memory_space<vmem>>, vector<16x128xf32>
    tpu.vector_store %arg11[%c0_179, %c0_180], %443 {strides = array<i32>} : memref<16x128xf32, #tpu.memory_space<vmem>>, vector<16x128xf32>,
    return
  }
}

</mosaic_0001>

<bundles_post_ra>
// kernel: tile.9
= control target key start
LH: loop header
LB: loop body
LE: loop exit
PB: predicated region body
PF: predicated region fallthrough
CT: control target
= control target key end

     0   :  { %vm3_vm0 = vcmask 523264   ;;  %s34_s0 = inlined_call_operand.vmem [shape: f32[2,5,64], index: 0, kind: input, shape index: {}]   ;;  %s35_s1 = inlined_call_operand.vmem [shape: f32[10,64], index: 1, kind: output, shape index: {}]  }
   0x1   :  { %v2_v0 = vld [vmem:[%s34_s0] sm:$0x1f]   ;;  %v10_v1 = vld [vmem:[%s34_s0 + $0x8] sm:$0x1f]  }
   0x2   :  { %4 = vst.msk [vmem:[%s35_s1] sm:$0x1f] %vm3_vm0, %v2_v0   ;;  %11 = vst.msk [vmem:[%s35_s1 + $0x5] sm:$0x1f] %vm3_vm0, %v10_v1  }

// kernel: custom-call
= control target key start
LH: loop header
LB: loop body
LE: loop exit
PB: predicated region body
PF: predicated region fallthrough
CT: control target
= control target key end

     0   :  { %s6_s0 = inlined_call_operand.vmem [shape: f32[2,10], index: 0, kind: output, shape index: {}]  }

// kernel: vit_forward.1
= control target key start
LH: loop header
LB: loop body
LE: loop exit
PB: predicated region body
PF: predicated region fallthrough
CT: control target
= control target key end

     0   :  { %vm606_vm0 = vcmask 523264   ;;  %vm4412_vm1 = vmmov 0   ;;  %vm935_vm12 = vcmask 130048   ;;  %s5428_s3 = inlined_call_operand.vmem [shape: bf16[768,64], index: 3, kind: input, shape index: {}]   ;;  %s5429_s0 = inlined_call_operand.vmem [shape: bf16[16,768], index: 0, kind: input, shape index: {}]   ;;  %s5430_s1 = inlined_call_operand.vmem [shape: f32[16,64], index: 1, kind: input, shape index: {}]   ;;  %s5431_s4 = inlined_call_operand.vmem [shape: bf16[2,3,64,64], index: 4, kind: input, shape index: {}]   ;;  %s5432_s9 = inlined_call_operand.vmem [shape: f32[2,10,128], index: 9, kind: input, shape index: {}]   ;;  %s5433_s5 = inlined_call_operand.vmem [shape: bf16[2,4,64,64], index: 5, kind: input, shape index: {}]   ;;  %s5434_s2 = inlined_call_operand.vmem [shape: f32[16,16], index: 2, kind: input, shape index: {}]   ;;  %s5435_s6 = inlined_call_operand.vmem [shape: bf16[2,64,128], index: 6, kind: input, shape index: {}]   ;;  %s5436_s7 = inlined_call_operand.vmem [shape: bf16[2,128,64], index: 7, kind: input, shape index: {}]   ;;  %s5437_s8 = inlined_call_operand.vmem [shape: bf16[64,128], index: 8, kind: input, shape index: {}]   ;;  %s5438_s10 = inlined_call_operand.vmem [shape: f32[3,128], index: 10, kind: input, shape index: {}]   ;;  %s5439_s11 = inlined_call_operand.vmem [shape: f32[16,128], index: 11, kind: output, shape index: {}]  }
   0x1   :  { %v4176_v0 = vld [vmem:[%s5428_s3 + $0x78] sm:$0xff]   ;;  %v4180_v4 = vld [vmem:[%s5428_s3 + $0x70] sm:$0xff]   ;;  %v4184_v8 = vld [vmem:[%s5428_s3 + $0x68] sm:$0xff]  }
   0x2   :  { %v4177_v1 = vld [vmem:[%s5428_s3 + $0x38] sm:$0xff]   ;;  %3633 = vmatprep.subr.bf16.mxu0 %v4176_v0  ;;  %v4181_v5 = vld [vmem:[%s5428_s3 + $0x30] sm:$0xff]   ;;  %v4185_v9 = vld [vmem:[%s5428_s3 + $0x28] sm:$0xff]  }
   0x3   :  { %v4178_v2 = vld [vmem:[%s5428_s3 + $0xf8] sm:$0xff]   ;;  %3634 = vmatpush3.bf16.msra.mxu0 %v4177_v1  ;;  %v4182_v6 = vld [vmem:[%s5428_s3 + $0xf0] sm:$0xff]   ;;  %v4186_v10 = vld [vmem:[%s5428_s3 + $0xe8] sm:$0xff]  }
   0x4   :  { %v4179_v3 = vld [vmem:[%s5428_s3 + $0xb8] sm:$0xff]   ;;  %3655 = vmatprep.subr.bf16.mxu1 %v4178_v2  ;;  %3635 = vmatprep.subr.bf16.mxu0 %v4180_v4  ;;  %v4183_v7 = vld [vmem:[%s5428_s3 + $0xb0] sm:$0xff]   ;;  %v4187_v11 = vld [vmem:[%s5428_s3 + $0xa8] sm:$0xff]  }
   0x5   :  { %3656 = vmatpush3.bf16.msra.mxu1 %v4179_v3  ;;  %v4188_v12 = vld [vmem:[%s5428_s3 + $0x60] sm:$0xff]   ;;  %v4192_v16 = vld [vmem:[%s5428_s3 + $0x58] sm:$0xff]   ;;  %v4196_v20 = vld [vmem:[%s5428_s3 + $0x50] sm:$0xff]  }
   0x6   :  { %3657 = vmatprep.subr.bf16.mxu1 %v4182_v6  ;;  %v4189_v13 = vld [vmem:[%s5428_s3 + $0x20] sm:$0xff]   ;;  %v4193_v17 = vld [vmem:[%s5428_s3 + $0x18] sm:$0xff]   ;;  %v4197_v21 = vld [vmem:[%s5428_s3 + $0x10] sm:$0xff]  }
   0x7   :  { %3636 = vmatpush3.bf16.msra.mxu0 %v4181_v5  ;;  %v4190_v14 = vld [vmem:[%s5428_s3 + $0xe0] sm:$0xff]   ;;  %v4194_v18 = vld [vmem:[%s5428_s3 + $0xd8] sm:$0xff]   ;;  %v4198_v22 = vld [vmem:[%s5428_s3 + $0xd0] sm:$0xff]  }
   0x8   :  { %3637 = vmatprep.subr.bf16.mxu0 %v4184_v8  ;;  %v4191_v15 = vld [vmem:[%s5428_s3 + $0xa0] sm:$0xff]   ;;  %v4195_v19 = vld [vmem:[%s5428_s3 + $0x98] sm:$0xff]   ;;  %v4199_v23 = vld [vmem:[%s5428_s3 + $0x90] sm:$0xff]  }
   0x9   :  { %3658 = vmatpush3.bf16.msra.mxu1 %v4183_v7  ;;  %v4200_v24 = vld [vmem:[%s5428_s3 + $0x48] sm:$0xff]   ;;  %v4204_v28 = vld [vmem:[%s5428_s3 + $0x40] sm:$0xff]   ;;  %v4211_v34 = vld [vmem:[%s5428_s3 + $0x178] sm:$0xff]  }
   0xa   :  { %3659 = vmatprep.subr.bf16.mxu1 %v4186_v10  ;;  %v4201_v25 = vld [vmem:[%s5428_s3 + $0x8] sm:$0xff]   ;;  %v4205_v29 = vld [vmem:[%s5428_s3] sm:$0xff]   ;;  %v4215_v37 = vld [vmem:[%s5428_s3 + $0x138] sm:$0xff]  }
   0xb   :  { %3638 = vmatpush3.bf16.msra.mxu0 %v4185_v9  ;;  %v4202_v26 = vld [vmem:[%s5428_s3 + $0xc8] sm:$0xff]   ;;  %v4206_v30 = vld [vmem:[%s5428_s3 + $0xc0] sm:$0xff]   ;;  %v4216_v38 = vld [vmem:[%s5428_s3 + $0x170] sm:$0xff]  }
   0xc   :  { %3639 = vmatprep.subr.bf16.mxu0 %v4188_v12  ;;  %v4203_v27 = vld [vmem:[%s5428_s3 + $0x88] sm:$0xff]   ;;  %v4207_v31 = vld [vmem:[%s5429_s0] ss:$24 sps:$4 sm:$0xff]   ;;  %v4209_v32 = vld [vmem:[%s5429_s0 + $0x4] ss:$24 sps:$4 sm:$0xff]  }
   0xd   :  { %3660 = vmatpush3.bf16.msra.mxu1 %v4187_v11  ;;  %v4210_v33 = vld [vmem:[%s5428_s3 + $0x80] sm:$0xff]   ;;  %511 = vmatprep.mubr.bf16.mxu0 %v4209_v32  ;;  %v4217_v39 = vld [vmem:[%s5428_s3 + $0x130] sm:$0xff]   ;;  %v4218_v40 = vld [vmem:[%s5428_s3 + $0x168] sm:$0xff]  }
   0xe   :  { %3661 = vmatprep.subr.bf16.mxu1 %v4190_v14  ;;  %v4212_v35 = vld [vmem:[%s5429_s0 + $0x8] ss:$24 sps:$4 sm:$0xff]   ;;  %v4214_v36 = vld [vmem:[%s5429_s0 + $0xc] ss:$24 sps:$4 sm:$0xff]   ;;  %v4222_v44 = vld [vmem:[%s5428_s3 + $0x158] sm:$0xff]  }
   0xf   :  { %3640 = vmatpush3.bf16.msra.mxu0 %v4189_v13  ;;  %552 = vmatprep.mubr.bf16.mxu1 %v4214_v36  ;;  %v4219_v41 = vld [vmem:[%s5428_s3 + $0x128] sm:$0xff]   ;;  %v4220_v42 = vld [vmem:[%s5428_s3 + $0x160] sm:$0xff]   ;;  %v4223_v45 = vld [vmem:[%s5428_s3 + $0x118] sm:$0xff]  }
  0x10   :  { %3641 = vmatprep.subr.bf16.mxu0 %v4192_v16  ;;  %v4221_v43 = vld [vmem:[%s5428_s3 + $0x120] sm:$0xff]   ;;  %v4224_v46 = vld [vmem:[%s5428_s3 + $0x150] sm:$0xff]   ;;  %v4226_v49 = vld [vmem:[%s5428_s3 + $0x148] sm:$0xff]  }
  0x11   :  { %3662 = vmatpush3.bf16.msra.mxu1 %v4191_v15  ;;  %v4232_v47 = vld [vmem:[%s5429_s0 + $0x14] ss:$24 sps:$4 sm:$0xff]   ;;  %v4228_v51 = vld [vmem:[%s5428_s3 + $0x140] sm:$0xff]   ;;  %v4230_v53 = vld [vmem:[%s5429_s0 + $0x10] ss:$24 sps:$4 sm:$0xff]  }
  0x12   :  { %3663 = vmatprep.subr.bf16.mxu1 %v4194_v18  ;;  %v4225_v48 = vld [vmem:[%s5428_s3 + $0x110] sm:$0xff]   ;;  %v4227_v50 = vld [vmem:[%s5428_s3 + $0x108] sm:$0xff]   ;;  %v4229_v52 = vld [vmem:[%s5428_s3 + $0x100] sm:$0xff]  }
  0x13   :  { %3642 = vmatpush3.bf16.msra.mxu0 %v4193_v17  ;;  %v159_v60 = vld [vmem:[%s5430_s1] sm:$0xff]  ;;  %v160_v2 = vld [vmem:[%s5430_s1 + $0x8] sm:$0xff]  ;;  %v4236_v32 = vld [vmem:[%s5431_s4 + $0x50] sm:$0xff]  }
  0x14   :  { %3643 = vmatprep.subr.bf16.mxu0 %v4196_v20  ;;  %v4240_v36 = vld [vmem:[%s5431_s4 + $0x40] sm:$0xff]  }
  0x15   :  { %3664 = vmatpush3.bf16.msra.mxu1 %v4195_v19 }
  0x16   :  { %3665 = vmatprep.subr.bf16.mxu1 %v4198_v22 }
  0x17   :  { %3644 = vmatpush3.bf16.msra.mxu0 %v4197_v21 }
  0x18   :  { %3645 = vmatprep.subr.bf16.mxu0 %v4200_v24 }
  0x19   :  { %3666 = vmatpush3.bf16.msra.mxu1 %v4199_v23 }
  0x1a   :  { %3667 = vmatprep.subr.bf16.mxu1 %v4202_v26 }
  0x1b   :  { %3646 = vmatpush3.bf16.msra.mxu0 %v4201_v25 }
  0x1c   :  { %3647 = vmatprep.subr.bf16.mxu0 %v4204_v28  ;;  %v4233_v28 = vld [vmem:[%s5431_s4 + $0x18] sm:$0xff]  }
  0x1d   :  { %3668 = vmatpush3.bf16.msra.mxu1 %v4203_v27 }
  0x1e   :  { %3669 = vmatprep.subr.bf16.mxu1 %v4206_v30  ;;  %v4234_v30 = vld [vmem:[%s5431_s4 + $0x58] sm:$0xff]  }
  0x1f   :  { %3648 = vmatpush3.bf16.msra.mxu0 %v4205_v29  ;;  %v4411_v29 = vmov 0.0  }
  0x20   :  { %3677 = vmatprep.subr.bf16.mxu0 %v4211_v34  ;;  %v4238_v34 = vld [vmem:[%s5431_s4 + $0x48] sm:$0xff]  }
  0x21   :  { %3670 = vmatpush3.bf16.msra.mxu1 %v4210_v33  ;;  %v4237_v33 = vld [vmem:[%s5431_s4 + $0x8] sm:$0xff]  }
  0x22   :  { %512 = vmatmul.mubr.bf16.vlgmr.msra.gmra.mxu0 %v4207_v31  ;;  %3834 = vmatprep.subr.bf16.mxu1 %v4411_v29  ;;  %v4235_v31 = vld [vmem:[%s5431_s4 + $0x10] sm:$0xff]  }
  0x23   :  { %3678 = vmatpush3.bf16.msra.mxu0 %v4215_v37  ;;  %593 = vmatprep.mubr.bf16.mxu0 %v4232_v47 }
  0x24   :  { %553 = vmatmul.mubr.bf16.vlgmr.msra.gmra.mxu1 %v4212_v35  ;;  %3679 = vmatprep.subr.bf16.mxu0 %v4216_v38  ;;  %v4239_v35 = vld [vmem:[%s5431_s4] sm:$0xff]  }
  0x25   :  { %3835 = vmatpush3.bf16.msra.mxu1 %v4233_v28  ;;  %3842 = vmatprep.mubr.msk.bf16.mxu1 %vm4412_vm1, %v4411_v29 }
  0x26   :  { %3836 = vmatprep.subr.bf16.mxu1 %v4411_v29 }
  0x27   :  { %3680 = vmatpush3.bf16.msra.mxu0 %v4217_v39 }
  0x28   :  { %3681 = vmatprep.subr.bf16.mxu0 %v4218_v40 }
  0x29   :  { %3837 = vmatpush3.bf16.msra.mxu1 %v4235_v31 }
  0x2a   :  { %3838 = vmatprep.subr.bf16.mxu1 %v4411_v29 }
  0x2b   :  { %3682 = vmatpush3.bf16.msra.mxu0 %v4219_v41 }
  0x2c   :  { %3683 = vmatprep.subr.bf16.mxu0 %v4220_v42 }
  0x2d   :  { %3839 = vmatpush3.bf16.msra.mxu1 %v4237_v33 }
  0x2e   :  { %3840 = vmatprep.subr.bf16.mxu1 %v4411_v29 }
  0x2f   :  { %3684 = vmatpush3.bf16.msra.mxu0 %v4221_v43  ;;  %v39_v43 = vlaneseq }
  0x30   :  { %3685 = vmatprep.subr.bf16.mxu0 %v4222_v44 }
  0x31   :  { %3841 = vmatpush3.bf16.msra.mxu1 %v4239_v35  ;;  %v4691_v44 = vshrl.u32 %v39_v43, 7  ;;  %v4245_v35 = vld [vmem:[%s5433_s5 + $0x18] sm:$0xff]  }
  0x32   :  { %3846 = vmatprep.subr.bf16.mxu1 %v4411_v29 }
  0x33   :  { %3686 = vmatpush3.bf16.msra.mxu0 %v4223_v45  ;;  %v4694_v45 = vsub.s32 0, %v4691_v44 }
  0x34   :  { %3687 = vmatprep.subr.bf16.mxu0 %v4224_v46  ;;  %v4699_v46 = vld [vmem:[%s5432_s9] sm:$0xff] }
  0x37   :  { %3688 = vmatpush3.bf16.msra.mxu0 %v4225_v48 }
  0x38   :  { %3689 = vmatprep.subr.bf16.mxu0 %v4226_v49  ;;  %v637_v49 = vrot.slane %v4699_v46, %v4694_v45 }
  0x3b   :  { %3690 = vmatpush3.bf16.msra.mxu0 %v4227_v50  ;;  %v4704_v50 = vsub.s32 1, %v4691_v44 }
  0x3c   :  { %3691 = vmatprep.subr.bf16.mxu0 %v4228_v51 }
  0x3f   :  { %3692 = vmatpush3.bf16.msra.mxu0 %v4229_v52 }
  0x40   :  { %3858 = vmatprep.subr.bf16.mxu0 %v4411_v29 }
  0x42   :  { %594 = vmatmul.mubr.bf16.vlgmr.msra.gmra.mxu0 %v4230_v53 }
  0x43   :  { %3859 = vmatpush3.bf16.msra.mxu0 %v4234_v30  ;;  %3866 = vmatprep.mubr.msk.bf16.mxu0 %vm4412_vm1, %v4411_v29 }
  0x44   :  { %3860 = vmatprep.subr.bf16.mxu0 %v4411_v29 }
  0x47   :  { %3861 = vmatpush3.bf16.msra.mxu0 %v4236_v32 }
  0x48   :  { %3862 = vmatprep.subr.bf16.mxu0 %v4411_v29 }
  0x4b   :  { %3863 = vmatpush3.bf16.msra.mxu0 %v4238_v34 }
  0x4c   :  { %3864 = vmatprep.subr.bf16.mxu0 %v4411_v29 }
  0x4f   :  { %3865 = vmatpush3.bf16.msra.mxu0 %v4240_v36  ;;  %v4246_v36 = vld [vmem:[%s5433_s5 + $0x38] sm:$0xff]  }
  0x50   :  { %3888 = vmatprep.subr.bf16.mxu0 %v4411_v29 }
  0xe2   :  { %v3649_v54 = vpop.f32.mrf.mxu0 }
  0xe4   :  { %v3650_v55 = vpop.f32.mrf.mxu0  ;;  %v3671_v56 = vpop.f32.mrf.mxu1 }
  0xe5   :  { %v3651_v59 = vadd.f32 %v3650_v55, %v3649_v54  ;;  %v643_v54 = vrot.slane %v4699_v46, %v4704_v50 }
  0xe6   :  { %v3652_v57 = vpop.f32.mrf.mxu0  ;;  %v3672_v58 = vpop.f32.mrf.mxu1 }
  0xe7   :  { %v514_v63 = vadd.f32 %v3651_v59, %v159_v60  ;;  %v3673_v0 = vadd.f32 %v3672_v58, %v3671_v56  ;;  %v4241_v58 = vld [vmem:[%s5431_s4 + $0x38] sm:$0xff]   ;;  %v4242_v60 = vld [vmem:[%s5431_s4 + $0x30] sm:$0xff]  }
  0xe8   :  { %v3653_v61 = vpop.f32.mrf.mxu0  ;;  %v3674_v62 = vpop.f32.mrf.mxu1 }
  0xe9   :  { %v3654_v1 = vadd.f32 %v3653_v61, %v3652_v57  ;;  %v555_v6 = vadd.f32 %v3673_v0, %v514_v63  ;;  %v4243_v61 = vld [vmem:[%s5431_s4 + $0x28] sm:$0xff]   ;;  %v4733_v63 = vand.u32 127, %v39_v43  ;;  %v4736_v0 = vsub.s32 2, %v4691_v44 }
  0xea   :  { %v3675_v3 = vpop.f32.mrf.mxu1  ;;  %v4250_v43 = vld [vmem:[%s5433_s5 + $0x28] sm:$0xff]  }
  0xeb   :  { %v517_v7 = vadd.f32 %v3654_v1, %v160_v2  ;;  %v3676_v8 = vadd.f32 %v3675_v3, %v3674_v62  ;;  %v4244_v62 = vld [vmem:[%s5431_s4 + $0x20] sm:$0xff]   ;;  %vm53_vm2 = vcmp.ge.s32.totalorder %v4733_v63, 48  ;;  %vm54_vm3 = vcmp.lt.s32.totalorder %v4733_v63, 64 }
  0xec   :  { %v658_v1 = vrot.slane %v4699_v46, %v4736_v0  ;;  %vm55_vm4 = vmand %vm53_vm2, %vm54_vm3  ;;  %vm45_vm5 = vcmp.ge.s32.totalorder %v4733_v63, 16  ;;  %vm46_vm6 = vcmp.lt.s32.totalorder %v4733_v63, 32  ;;  %vm42_vm7 = vcmp.lt.s32.totalorder %v4733_v63, 16 }
  0xed   :  { %v558_v13 = vadd.f32 %v3676_v8, %v517_v7  ;;  %v4747_v7 = vsel %vm55_vm4, 0.25, %v4411_v29  ;;  %vm47_vm8 = vmand %vm45_vm5, %vm46_vm6  ;;  %v4772_v28 = vsel %vm42_vm7, 0.25, %v4411_v29  ;;  %vm49_vm9 = vcmp.ge.s32.totalorder %v4733_v63, 32 }
  0xee   :  { %v4775_v30 = vsel %vm47_vm8, 0.25, %v4411_v29  ;;  %vm50_vm10 = vcmp.lt.s32.totalorder %v4733_v63, 48 }
  0xef   :  { %vm51_vm11 = vmand %vm49_vm9, %vm50_vm10 }
 0x102   :  { %v3693_v4 = vpop.f32.mrf.mxu0 }
 0x104   :  { %v3694_v5 = vpop.f32.mrf.mxu0 }
 0x105   :  { %v3695_v9 = vadd.f32 %v3694_v5, %v3693_v4 }
 0x106   :  { %v3696_v10 = vpop.f32.mrf.mxu0 }
 0x107   :  { %v4641_v11 = vadd.f32 %v3695_v9, %v555_v6 }
 0x108   :  { %v3697_v12 = vpop.f32.mrf.mxu0 }
 0x109   :  { %v3698_v14 = vadd.f32 %v3697_v12, %v3696_v10  ;;  %v607_v15 = vsel %vm606_vm0, %v4641_v11, 0.0 }
 0x10a   :  { %608 = vadd.xlane.f32.xlu0 %v607_v15 }
 0x10b   :  { %v4645_v16 = vadd.f32 %v3698_v14, %v558_v13 }
 0x10d   :  { %v610_v17 = vsel %vm606_vm0, %v4645_v16, 0.0 }
 0x10e   :  { %611 = vadd.xlane.f32.xlu0 %v610_v17 }
 0x193   :  { %v609_v18 = vpop.xlane.xlu0 %608 }
 0x194   :  { %v614_v19 = vmul.f32 0.015625, %v609_v18  ;;  %v738_v18 = vsub.s32 3, %v4691_v44 }
 0x196   :  { %v616_v20 = vsub.f32 %v4641_v11, %v614_v19 }
 0x197   :  { %v612_v21 = vpop.xlane.xlu0 %611 }
 0x198   :  { %v615_v22 = vmul.f32 0.015625, %v612_v21  ;;  %v618_v23 = vmul.f32 %v616_v20, %v616_v20 }
 0x19a   :  { %v617_v24 = vsub.f32 %v4645_v16, %v615_v22  ;;  %v620_v25 = vsel %vm606_vm0, %v618_v23, 0.0 }
 0x19b   :  { %621 = vadd.xlane.f32.xlu1 %v620_v25 }
 0x19c   :  { %v619_v26 = vmul.f32 %v617_v24, %v617_v24 }
 0x19e   :  { %v623_v27 = vsel %vm606_vm0, %v619_v26, 0.0 }
 0x19f   :  { %624 = vadd.xlane.f32.xlu1 %v623_v27 }
 0x224   :  { %v622_v37 = vpop.xlane.xlu1 %621 }
 0x225   :  { %v626_v38 = vmul.f32 0.015625, %v622_v37 }
 0x227   :  { %v628_v39 = vadd.f32 1e-06, %v626_v38 }
 0x228   :  { %v625_v40 = vpop.xlane.xlu1 %624 }
 0x229   :  { %4317 = vrsqrt.f32 %v628_v39  ;;  %v627_v41 = vmul.f32 0.015625, %v625_v40  ;;  %v4247_v39 = vld [vmem:[%s5433_s5 + $0x10] sm:$0xff]  }
 0x22a   :  { %v4248_v40 = vld [vmem:[%s5433_s5 + $0x30] sm:$0xff]  }
 0x22b   :  { %v629_v42 = vadd.f32 1e-06, %v627_v41  ;;  %v816_v41 = vsub.s32 4, %v4691_v44 }
 0x22d   :  { %4319 = vrsqrt.f32 %v629_v42  ;;  %v4249_v42 = vld [vmem:[%s5433_s5 + $0x8] sm:$0xff]  }
 0x236   :  { %v4318_v47 = vpop.eup %4317 }
 0x237   :  { %v632_v48 = vmul.f32 %v4318_v47, %v616_v20  ;;  %v739_v20 = vrot.slane %v4699_v46, %v738_v18  ;;  %v817_v47 = vrot.slane %v4699_v46, %v816_v41 }
 0x239   :  { %v638_v53 = vmul.f32 %v637_v49, %v632_v48  ;;  %v4251_v48 = vld [vmem:[%s5433_s5] sm:$0xff]  }
 0x23a   :  { %v4320_v51 = vpop.eup %4319 }
 0x23b   :  { %v633_v52 = vmul.f32 %v4320_v51, %v617_v24  ;;  %v644_v56 = vadd.f32 %v643_v54, %v638_v53 }
 0x23d   :  { %v639_v55 = vmul.f32 %v637_v49, %v633_v52  ;;  %v4252_v49 = vld [vmem:[%s5433_s5 + $0x20] sm:$0xff]  }
 0x23f   :  { %v645_v57 = vadd.f32 %v643_v54, %v639_v55  ;;  %v4841_v54 = vsel %vm51_vm11, 0.25, %v4411_v29 }
 0x241   :  { %v646_v59 = vpack.c.bf16 %v645_v57, %v644_v56 }
 0x243   :  { %3843 = vmatmul.mubr.msk.bf16.vlgmr.msra.gmra.mxu1 %vm606_vm0, %v646_v59  ;;  %3867 = vmatmul.mubr.msk.bf16.vlgmr.msra.gmra.mxu0 %vm606_vm0, %v646_v59 }
 0x244   :  { %3847 = vmatpush3.bf16.msra.mxu1 %v4241_v58  ;;  %3854 = vmatprep.mubr.msk.bf16.mxu1 %vm4412_vm1, %v4411_v29  ;;  %v4859_v58 = vld [vmem:[%s5434_s2] sm:$0xff] }
 0x245   :  { %3848 = vmatprep.subr.bf16.mxu1 %v4411_v29  ;;  %3890 = vmatprep.mubr.msk.bf16.mxu0 %vm4412_vm1, %v4411_v29 }
 0x248   :  { %3849 = vmatpush3.bf16.msra.mxu1 %v4242_v60 }
 0x249   :  { %3850 = vmatprep.subr.bf16.mxu1 %v4411_v29 }
 0x24c   :  { %3851 = vmatpush3.bf16.msra.mxu1 %v4243_v61 }
 0x24d   :  { %3852 = vmatprep.subr.bf16.mxu1 %v4411_v29 }
 0x250   :  { %3853 = vmatpush3.bf16.msra.mxu1 %v4244_v62 }
 0x251   :  { %3870 = vmatprep.subr.bf16.mxu1 %v4411_v29 }
 0x253   :  { %3855 = vmatmul.mubr.msk.bf16.vlgmr.msra.gmra.mxu1 %vm606_vm0, %v646_v59 }
 0x254   :  { %3872 = vmatprep.mubr.msk.bf16.mxu1 %vm4412_vm1, %v4411_v29 }
 0x303   :  { %v720_v2 = vpop.f32.mrf.mxu1  ;;  %v4742_v3 = vpop.f32.mrf.mxu0 }
 0x304   :  { %v4744_v6 = vadd.f32 %v720_v2, %v658_v1  ;;  %v877_v52 = vadd.f32 %v4742_v3, %v817_v47 }
 0x305   :  { %v3844_v4 = vpop.f32.mrf.mxu1  ;;  %v3868_v5 = vpop.f32.mrf.mxu0 }
 0x306   :  { %v4753_v14 = vmul.f32 %v4744_v6, %v4747_v7  ;;  %v885_v33 = vmul.f32 %v4744_v6, %v4772_v28  ;;  %v1036_v34 = vmul.f32 %v4744_v6, %v4775_v30  ;;  %v1269_v56 = vmul.f32 %v4744_v6, %v4841_v54 }
 0x307   :  { %v723_v8 = vpop.f32.mrf.mxu1  ;;  %v879_v9 = vpop.f32.mrf.mxu0 }
 0x308   :  { %v4749_v10 = vadd.f32 %v723_v8, %v658_v1  ;;  %v880_v51 = vadd.f32 %v879_v9, %v817_v47  ;;  %v4865_v1 = vld [vmem:[%s5434_s2 + $0x8] sm:$0xff] }
 0x309   :  { %v3845_v12 = vpop.f32.mrf.mxu1  ;;  %v3869_v13 = vpop.f32.mrf.mxu0 }
 0x30a   :  { %v4757_v15 = vmul.f32 %v4749_v10, %v4747_v7  ;;  %v886_v31 = vmul.f32 %v4749_v10, %v4772_v28  ;;  %v1037_v32 = vmul.f32 %v4749_v10, %v4775_v30  ;;  %v4832_v53 = vpack.c.bf16 %v880_v51, %v877_v52 }
 0x30b   :  { %v1270_v55 = vmul.f32 %v4749_v10, %v4841_v54 }
 0x30c   :  { %v1462_v17 = vpack.c.bf16 %v4757_v15, %v4753_v14  ;;  %v887_v37 = vpack.c.bf16 %v886_v31, %v885_v33  ;;  %v1038_v38 = vpack.c.bf16 %v1037_v32, %v1036_v34 }
 0x30d   :  { %v1271_v57 = vpack.c.bf16 %v1270_v55, %v1269_v56 }
 0x313   :  { %v798_v19 = vpop.f32.mrf.mxu1 }
 0x314   :  { %v799_v23 = vadd.f32 %v798_v19, %v739_v20 }
 0x315   :  { %v3856_v21 = vpop.f32.mrf.mxu1 }
 0x317   :  { %v801_v22 = vpop.f32.mrf.mxu1 }
 0x318   :  { %v802_v24 = vadd.f32 %v801_v22, %v739_v20 }
 0x319   :  { %v3857_v25 = vpop.f32.mrf.mxu1 }
 0x31a   :  { %v883_v26 = vpack.c.bf16 %v802_v24, %v799_v23 }
 0x31c   :  { %v4769_v27 = vsel %vm606_vm0, %v883_v26, 0 }
 0x31d   :  { %3871 = vmatpush3.bf16.xpose.msra.mxu1 %v4769_v27  ;;  %3889 = vmatpush3.bf16.xpose.msra.mxu0 %v4769_v27 }
 0x31e   :  { %3876 = vmatprep.subr.bf16.mxu1 %v4411_v29  ;;  %3894 = vmatprep.subr.bf16.mxu0 %v4411_v29 }
 0x324   :  { %3873 = vmatmul.mubr.msk.bf16.vlgmr.msra.gmra.mxu1 %vm606_vm0, %v887_v37  ;;  %3891 = vmatmul.mubr.msk.bf16.vlgmr.msra.gmra.mxu0 %vm606_vm0, %v1038_v38 }
 0x325   :  { %3877 = vmatpush3.bf16.msra.mxu1 %v4245_v35  ;;  %3895 = vmatpush3.bf16.msra.mxu0 %v4246_v36 }
 0x326   :  { %3878 = vmatprep.subr.bf16.mxu1 %v4411_v29  ;;  %3896 = vmatprep.subr.bf16.mxu0 %v4411_v29 }
 0x327   :  { %3884 = vmatprep.mubr.msk.bf16.mxu1 %vm4412_vm1, %v4411_v29  ;;  %3902 = vmatprep.mubr.msk.bf16.mxu0 %vm4412_vm1, %v4411_v29 }
 0x329   :  { %3879 = vmatpush3.bf16.msra.mxu1 %v4247_v39  ;;  %3897 = vmatpush3.bf16.msra.mxu0 %v4248_v40 }
 0x32a   :  { %3880 = vmatprep.subr.bf16.mxu1 %v4411_v29  ;;  %3898 = vmatprep.subr.bf16.mxu0 %v4411_v29 }
 0x32d   :  { %3881 = vmatpush3.bf16.msra.mxu1 %v4249_v42  ;;  %3899 = vmatpush3.bf16.msra.mxu0 %v4250_v43 }
 0x32e   :  { %3882 = vmatprep.subr.bf16.mxu1 %v4411_v29  ;;  %3900 = vmatprep.subr.bf16.mxu0 %v4411_v29 }
 0x331   :  { %3883 = vmatpush3.bf16.msra.mxu1 %v4251_v48  ;;  %3901 = vmatpush3.bf16.msra.mxu0 %v4252_v49 }
 0x332   :  { %3918 = vmatprep.subr.bf16.mxu0 %v4411_v29  ;;  %3906 = vmatprep.subr.bf16.mxu1 %v4411_v29 }
 0x334   :  { %3885 = vmatmul.mubr.msk.bf16.vlgmr.msra.gmra.mxu1 %vm606_vm0, %v4832_v53  ;;  %3903 = vmatmul.mubr.msk.bf16.vlgmr.msra.gmra.mxu0 %vm606_vm0, %v4832_v53 }
 0x335   :  { %3919 = vmatpush3.bf16.xpose.msra.mxu0 %v4769_v27  ;;  %3920 = vmatprep.mubr.msk.bf16.mxu0 %vm4412_vm1, %v4411_v29 }
 0x336   :  { %3908 = vmatprep.mubr.msk.bf16.mxu1 %vm4412_vm1, %v4411_v29  ;;  %3936 = vmatprep.subr.bf16.mxu0 %v4411_v29 }
 0x33c   :  { %3921 = vmatmul.mubr.msk.bf16.vlgmr.msra.gmra.mxu0 %vm606_vm0, %v1271_v57 }
 0x33d   :  { %3938 = vmatprep.mubr.msk.bf16.mxu0 %vm4412_vm1, %v4411_v29 }
 0x3e4   :  { %v928_v59 = vpop.f32.mrf.mxu1  ;;  %v1076_v60 = vpop.f32.mrf.mxu0 }
 0x3e5   :  { %v1077_v61 = vadd.f32 %v1076_v60, %v4859_v58  ;;  %v929_v2 = vadd.f32 %v928_v59, %v4859_v58 }
 0x3e6   :  { %v3874_v62 = vpop.f32.mrf.mxu1  ;;  %v3892_v63 = vpop.f32.mrf.mxu0 }
 0x3e7   :  { %v1083_v3 = vsel %vm935_vm12, %v1077_v61, -inf  ;;  %v936_v13 = vsel %vm935_vm12, %v929_v2, -inf }
 0x3e8   :  { %1084 = vmax.xlane.f32.xlu0 %v1083_v3  ;;  %v931_v4 = vpop.f32.mrf.mxu1  ;;  %v1079_v5 = vpop.f32.mrf.mxu0 }
 0x3e9   :  { %v1080_v6 = vadd.f32 %v1079_v5, %v4865_v1  ;;  %v932_v10 = vadd.f32 %v931_v4, %v4865_v1 }
 0x3ea   :  { %v3875_v8 = vpop.f32.mrf.mxu1  ;;  %v3893_v9 = vpop.f32.mrf.mxu0 }
 0x3eb   :  { %v1086_v12 = vsel %vm935_vm12, %v1080_v6, -inf  ;;  %v939_v19 = vsel %vm935_vm12, %v932_v10, -inf }
 0x3ec   :  { %1087 = vmax.xlane.f32.xlu1 %v1086_v12  ;;  %937 = vmax.xlane.f32.xlu0 %v936_v13 }
 0x3f0   :  { %940 = vmax.xlane.f32.xlu1 %v939_v19 }
 0x3f4   :  { %v4874_v20 = vpop.f32.mrf.mxu1  ;;  %v1172_v21 = vpop.f32.mrf.mxu0 }
 0x3f6   :  { %v3886_v22 = vpop.f32.mrf.mxu1  ;;  %v3904_v23 = vpop.f32.mrf.mxu0 }
 0x3f8   :  { %v4876_v24 = vpop.f32.mrf.mxu1  ;;  %v1175_v25 = vpop.f32.mrf.mxu0 }
 0x3f9   :  { %v1035_v26 = vpack.c.bf16 %v4876_v24, %v4874_v20  ;;  %v1180_v31 = vpack.c.bf16 %v1175_v25, %v1172_v21  ;;  %v4254_v24 = vld [vmem:[%s5433_s5 + $0x50] sm:$0xff]  }
 0x3fa   :  { %v3887_v32 = vpop.f32.mrf.mxu1  ;;  %v3905_v33 = vpop.f32.mrf.mxu0 }
 0x3fb   :  { %3907 = vmatpush3.bf16.msra.mxu1 %v1180_v31 }
 0x3fc   :  { %v1309_v34 = vpop.f32.mrf.mxu0  ;;  %3912 = vmatprep.subr.bf16.mxu1 %v4411_v29 }
 0x3fd   :  { %v1310_v63 = vadd.f32 %v1309_v34, %v4859_v58 }
 0x3fe   :  { %v3922_v35 = vpop.f32.mrf.mxu0 }
 0x400   :  { %v1312_v36 = vpop.f32.mrf.mxu0 }
 0x401   :  { %v1313_v4 = vadd.f32 %v1312_v36, %v4865_v1 }
 0x402   :  { %v3923_v37 = vpop.f32.mrf.mxu0 }
 0x403   :  { %v1319_v8 = vsel %vm935_vm12, %v1313_v4, -inf }
 0x471   :  { %v1085_v38 = vpop.xlane.xlu0 %1084 }
 0x472   :  { %v1089_v39 = vsub.f32 %v1077_v61, %v1085_v38 }
 0x474   :  { %v1091_v40 = vmul.f32 1.442695, %v1089_v39 }
 0x475   :  { %v1088_v42 = vpop.xlane.xlu1 %1087  ;;  %v938_v43 = vpop.xlane.xlu0 %937 }
 0x476   :  { %4321 = vpow2.f32 %v1091_v40  ;;  %v1090_v47 = vsub.f32 %v1080_v6, %v1088_v42  ;;  %v942_v48 = vsub.f32 %v929_v2, %v938_v43  ;;  %v1316_v6 = vsel %vm935_vm12, %v1310_v63, -inf }
 0x478   :  { %v1093_v49 = vmul.f32 1.442695, %v1090_v47  ;;  %v944_v51 = vmul.f32 1.442695, %v942_v48  ;;  %v4253_v47 = vld [vmem:[%s5433_s5 + $0x58] sm:$0xff]  }
 0x479   :  { %v941_v52 = vpop.xlane.xlu1 %940 }
 0x47a   :  { %4323 = vpow2.f32 %v1093_v49  ;;  %v943_v55 = vsub.f32 %v932_v10, %v941_v52  ;;  %v4257_v52 = vld [vmem:[%s5433_s5 + $0x78] sm:$0xff]  }
 0x47b   :  { %4325 = vpow2.f32 %v944_v51  ;;  %v4256_v51 = vld [vmem:[%s5433_s5 + $0x40] sm:$0xff]  }
 0x47c   :  { %v946_v56 = vmul.f32 1.442695, %v943_v55  ;;  %v4258_v55 = vld [vmem:[%s5433_s5 + $0x70] sm:$0xff]  }
 0x47e   :  { %4327 = vpow2.f32 %v946_v56  ;;  %v4259_v56 = vld [vmem:[%s5433_s5 + $0x68] sm:$0xff]  }
 0x483   :  { %v4322_v57 = vpop.eup %4321 }
 0x484   :  { %v1095_v59 = vsel %vm935_vm12, %v4322_v57, 0.0 }
 0x485   :  { %1096 = vadd.xlane.f32.xlu0 %v1095_v59 }
 0x487   :  { %v4324_v60 = vpop.eup %4323 }
 0x488   :  { %v4326_v61 = vpop.eup %4325  ;;  %v1098_v62 = vsel %vm935_vm12, %v4324_v60, 0.0 }
 0x489   :  { %v948_v2 = vsel %vm935_vm12, %v4326_v61, 0.0  ;;  %1099 = vadd.xlane.f32.xlu1 %v1098_v62 }
 0x48a   :  { %949 = vadd.xlane.f32.xlu0 %v948_v2 }
 0x48b   :  { %v4328_v3 = vpop.eup %4327 }
 0x48c   :  { %v951_v5 = vsel %vm935_vm12, %v4328_v3, 0.0 }
 0x48d   :  { %952 = vadd.xlane.f32.xlu1 %v951_v5 }
 0x48e   :  { %1317 = vmax.xlane.f32.xlu0 %v1316_v6 }
 0x491   :  { %1320 = vmax.xlane.f32.xlu1 %v1319_v8 }
 0x50e   :  { %v1097_v9 = vpop.xlane.xlu0 %1096 }
 0x50f   :  { %4329 = vrcp.f32 %v1097_v9 }
 0x512   :  { %v1100_v10 = vpop.xlane.xlu1 %1099 }
 0x513   :  { %v950_v12 = vpop.xlane.xlu0 %949  ;;  %4331 = vrcp.f32 %v1100_v10 }
 0x516   :  { %v953_v13 = vpop.xlane.xlu1 %952 }
 0x517   :  { %v1318_v19 = vpop.xlane.xlu0 %1317  ;;  %4333 = vrcp.f32 %v953_v13 }
 0x518   :  { %v1322_v21 = vsub.f32 %v1310_v63, %v1318_v19  ;;  %4335 = vrcp.f32 %v950_v12 }
 0x51a   :  { %v1324_v22 = vmul.f32 1.442695, %v1322_v21  ;;  %v1321_v23 = vpop.xlane.xlu1 %1320 }
 0x51b   :  { %v1323_v25 = vsub.f32 %v1313_v4, %v1321_v23 }
 0x51c   :  { %4337 = vpow2.f32 %v1324_v22  ;;  %v4330_v32 = vpop.eup %4329 }
 0x51d   :  { %v1326_v31 = vmul.f32 1.442695, %v1323_v25  ;;  %v1103_v34 = vmul.f32 %v4330_v32, %v4322_v57  ;;  %v4260_v57 = vld [vmem:[%s5433_s5 + $0x60] sm:$0xff]  }
 0x51f   :  { %4339 = vpow2.f32 %v1326_v31 }
 0x520   :  { %v4332_v33 = vpop.eup %4331 }
 0x521   :  { %v1104_v35 = vmul.f32 %v4332_v33, %v4324_v60 }
 0x523   :  { %v1179_v36 = vpack.c.bf16 %v1104_v35, %v1103_v34 }
 0x524   :  { %v4334_v37 = vpop.eup %4333 }
 0x525   :  { %3909 = vmatmul.mubr.msk.bf16.vlgmr.msra.gmra.mxu1 %vm935_vm12, %v1179_v36  ;;  %v4336_v38 = vpop.eup %4335  ;;  %v957_v39 = vmul.f32 %v4334_v37, %v4328_v3 }
 0x526   :  { %3913 = vmatpush3.bf16.msra.mxu1 %v1035_v26  ;;  %3914 = vmatprep.mubr.msk.bf16.mxu1 %vm4412_vm1, %v4411_v29  ;;  %v956_v42 = vmul.f32 %v4336_v38, %v4326_v61  ;;  %v4255_v26 = vld [vmem:[%s5433_s5 + $0x48] sm:$0xff]  }
 0x527   :  { %3924 = vmatprep.subr.bf16.mxu1 %v4411_v29 }
 0x528   :  { %v1034_v48 = vpack.c.bf16 %v957_v39, %v956_v42 }
 0x529   :  { %v4338_v40 = vpop.eup %4337 }
 0x52a   :  { %v1328_v43 = vsel %vm935_vm12, %v4338_v40, 0.0 }
 0x52b   :  { %1329 = vadd.xlane.f32.xlu0 %v1328_v43 }
 0x52c   :  { %v4340_v49 = vpop.eup %4339 }
 0x52d   :  { %3915 = vmatmul.mubr.msk.bf16.vlgmr.msra.gmra.mxu1 %vm935_vm12, %v1034_v48  ;;  %v1331_v20 = vsel %vm935_vm12, %v4340_v49, 0.0 }
 0x52e   :  { %3925 = vmatpush3.bf16.msra.mxu1 %v4253_v47  ;;  %1332 = vadd.xlane.f32.xlu1 %v1331_v20 }
 0x52f   :  { %3926 = vmatprep.subr.bf16.mxu1 %v4411_v29  ;;  %3932 = vmatprep.mubr.msk.bf16.mxu1 %vm4412_vm1, %v4411_v29 }
 0x532   :  { %3927 = vmatpush3.bf16.msra.mxu1 %v4254_v24 }
 0x533   :  { %3928 = vmatprep.subr.bf16.mxu1 %v4411_v29 }
 0x536   :  { %3929 = vmatpush3.bf16.msra.mxu1 %v4255_v26 }
 0x537   :  { %3930 = vmatprep.subr.bf16.mxu1 %v4411_v29 }
 0x53a   :  { %3931 = vmatpush3.bf16.msra.mxu1 %v4256_v51 }
 0x53b   :  { %3948 = vmatprep.subr.bf16.mxu1 %v4411_v29 }
 0x53d   :  { %3933 = vmatmul.mubr.msk.bf16.vlgmr.msra.gmra.mxu1 %vm606_vm0, %v4832_v53 }
 0x53e   :  { %3949 = vmatpush3.bf16.msra.mxu1 %v4257_v52  ;;  %3956 = vmatprep.mubr.msk.bf16.mxu1 %vm4412_vm1, %v4411_v29 }
 0x53f   :  { %3950 = vmatprep.subr.bf16.mxu1 %v4411_v29 }
 0x542   :  { %3951 = vmatpush3.bf16.msra.mxu1 %v4258_v55 }
 0x543   :  { %3952 = vmatprep.subr.bf16.mxu1 %v4411_v29 }
 0x546   :  { %3953 = vmatpush3.bf16.msra.mxu1 %v4259_v56 }
 0x547   :  { %3954 = vmatprep.subr.bf16.mxu1 %v4411_v29 }
 0x54a   :  { %3955 = vmatpush3.bf16.msra.mxu1 %v4260_v57 }
 0x54b   :  { %3978 = vmatprep.subr.bf16.mxu1 %v4411_v29 }
 0x54d   :  { %3957 = vmatmul.mubr.msk.bf16.vlgmr.msra.gmra.mxu1 %vm606_vm0, %v4832_v53 }
 0x54e   :  { %3994 = vmatprep.mubr.msk.bf16.mxu1 %vm4412_vm1, %v4411_v29 }
 0x5b4   :  { %v1330_v5 = vpop.xlane.xlu0 %1329 }
 0x5b7   :  { %v1333_v2 = vpop.xlane.xlu1 %1332 }
 0x5b8   :  { %4341 = vrcp.f32 %v1333_v2 }
 0x5b9   :  { %4343 = vrcp.f32 %v1330_v5  ;;  %v1655_v5 = vsub.s32 5, %v4691_v44 }
 0x5c5   :  { %v4342_v12 = vpop.eup %4341 }
 0x5c6   :  { %v4344_v13 = vpop.eup %4343  ;;  %v1337_v21 = vmul.f32 %v4342_v12, %v4340_v49 }
 0x5c7   :  { %v1336_v25 = vmul.f32 %v4344_v13, %v4338_v40 }
 0x5c9   :  { %v1412_v31 = vpack.c.bf16 %v1337_v21, %v1336_v25 }
 0x5e5   :  { %v1218_v59 = vpop.f32.mrf.mxu1 }
 0x5e7   :  { %v3910_v60 = vpop.f32.mrf.mxu1 }
 0x5e9   :  { %v1221_v61 = vpop.f32.mrf.mxu1 }
 0x5eb   :  { %v3911_v62 = vpop.f32.mrf.mxu1 }
 0x5ed   :  { %v1262_v63 = vpop.f32.mrf.mxu1 }
 0x5ee   :  { %v1263_v3 = vadd.f32 %v1262_v63, %v1218_v59 }
 0x5ef   :  { %v3916_v4 = vpop.f32.mrf.mxu1 }
 0x5f1   :  { %v1265_v6 = vpop.f32.mrf.mxu1 }
 0x5f2   :  { %v1266_v8 = vadd.f32 %v1265_v6, %v1221_v61 }
 0x5f3   :  { %v3917_v9 = vpop.f32.mrf.mxu1 }
 0x5f4   :  { %v1656_v9 = vrot.slane %v4699_v46, %v1655_v5 }
 0x5fd   :  { %v1405_v10 = vpop.f32.mrf.mxu1 }
 0x5ff   :  { %v3934_v53 = vpop.f32.mrf.mxu1 }
 0x601   :  { %v1408_v19 = vpop.f32.mrf.mxu1 }
 0x602   :  { %v1413_v22 = vpack.c.bf16 %v1408_v19, %v1405_v10 }
 0x603   :  { %v3935_v23 = vpop.f32.mrf.mxu1 }
 0x604   :  { %3937 = vmatpush3.bf16.msra.mxu0 %v1413_v22 }
 0x605   :  { %3942 = vmatprep.subr.bf16.mxu0 %v4411_v29 }
 0x607   :  { %3939 = vmatmul.mubr.msk.bf16.vlgmr.msra.gmra.mxu0 %vm935_vm12, %v1412_v31 }
 0x608   :  { %3943 = vmatpush3.bf16.xpose.msra.mxu0 %v4769_v27  ;;  %3944 = vmatprep.mubr.msk.bf16.mxu0 %vm4412_vm1, %v4411_v29 }
 0x609   :  { %3960 = vmatprep.subr.bf16.mxu0 %v4411_v29 }
 0x60d   :  { %v1596_v32 = vpop.f32.mrf.mxu1 }
 0x60f   :  { %3945 = vmatmul.mubr.msk.bf16.vlgmr.msra.gmra.mxu0 %vm606_vm0, %v1462_v17  ;;  %v3958_v33 = vpop.f32.mrf.mxu1 }
 0x610   :  { %3962 = vmatprep.mubr.msk.bf16.mxu0 %vm4412_vm1, %v4411_v29 }
 0x611   :  { %v1599_v34 = vpop.f32.mrf.mxu1 }
 0x612   :  { %v1604_v35 = vpack.c.bf16 %v1599_v34, %v1596_v32 }
 0x613   :  { %v3959_v36 = vpop.f32.mrf.mxu1 }
 0x614   :  { %3961 = vmatpush3.bf16.msra.mxu0 %v1604_v35 }
 0x615   :  { %3966 = vmatprep.subr.bf16.mxu0 %v4411_v29 }
 0x6c7   :  { %v1451_v27 = vpop.f32.mrf.mxu0 }
 0x6c8   :  { %v1458_v37 = vadd.f32 %v1451_v27, %v1263_v3 }
 0x6c9   :  { %v3940_v38 = vpop.f32.mrf.mxu0 }
 0x6cb   :  { %v1454_v39 = vpop.f32.mrf.mxu0 }
 0x6cc   :  { %v1459_v40 = vadd.f32 %v1454_v39, %v1266_v8  ;;  %v4261_v39 = vld [vmem:[%s5435_s6 + $0x18] sm:$0xff]  }
 0x6cd   :  { %v3941_v42 = vpop.f32.mrf.mxu0 }
 0x6ce   :  { %v4263_v42 = vld [vmem:[%s5435_s6 + $0x8] sm:$0xff]  }
 0x6cf   :  { %v1500_v43 = vpop.f32.mrf.mxu0 }
 0x6d0   :  { %v1501_v14 = vadd.f32 %v1500_v43, %v4859_v58  ;;  %v4264_v43 = vld [vmem:[%s5435_s6] sm:$0xff]  }
 0x6d1   :  { %v3946_v15 = vpop.f32.mrf.mxu0 }
 0x6d2   :  { %v1507_v17 = vsel %vm935_vm12, %v1501_v14, -inf }
 0x6d3   :  { %1508 = vmax.xlane.f32.xlu0 %v1507_v17  ;;  %v1503_v47 = vpop.f32.mrf.mxu0 }
 0x6d4   :  { %v1504_v48 = vadd.f32 %v1503_v47, %v4865_v1 }
 0x6d5   :  { %v3947_v49 = vpop.f32.mrf.mxu0 }
 0x6d6   :  { %v1510_v20 = vsel %vm935_vm12, %v1504_v48, -inf }
 0x6d7   :  { %1511 = vmax.xlane.f32.xlu1 %v1510_v20  ;;  %v1687_v20 = vsub.s32 6, %v4691_v44 }
 0x75c   :  { %v1509_v24 = vpop.xlane.xlu0 %1508 }
 0x75d   :  { %v1513_v26 = vsub.f32 %v1501_v14, %v1509_v24 }
 0x75f   :  { %v1515_v51 = vmul.f32 1.442695, %v1513_v26 }
 0x760   :  { %v1512_v52 = vpop.xlane.xlu1 %1511 }
 0x761   :  { %4345 = vpow2.f32 %v1515_v51  ;;  %v1514_v55 = vsub.f32 %v1504_v48, %v1512_v52  ;;  %v1688_v51 = vrot.slane %v4699_v46, %v1687_v20  ;;  %v1693_v52 = vsub.s32 7, %v4691_v44  ;;  %v4306_v44 = vld [vmem:[%s5436_s7 + $0x70] sm:$0xff]  }
 0x763   :  { %v1517_v56 = vmul.f32 1.442695, %v1514_v55 }
 0x765   :  { %4347 = vpow2.f32 %v1517_v56 }
 0x76e   :  { %v4346_v58 = vpop.eup %4345 }
 0x76f   :  { %v1519_v57 = vsel %vm935_vm12, %v4346_v58, 0.0 }
 0x770   :  { %1520 = vadd.xlane.f32.xlu0 %v1519_v57  ;;  %v1694_v57 = vrot.slane %v4699_v46, %v1693_v52  ;;  %v4266_v46 = vld [vmem:[%s5436_s7 + $0x30] sm:$0xff]  }
 0x772   :  { %v4348_v59 = vpop.eup %4347 }
 0x773   :  { %v1522_v60 = vsel %vm935_vm12, %v4348_v59, 0.0 }
 0x774   :  { %1523 = vadd.xlane.f32.xlu1 %v1522_v60 }
 0x7f9   :  { %v1521_v1 = vpop.xlane.xlu0 %1520 }
 0x7fa   :  { %4349 = vrcp.f32 %v1521_v1 }
 0x7fd   :  { %v1524_v61 = vpop.xlane.xlu1 %1523 }
 0x7fe   :  { %4351 = vrcp.f32 %v1524_v61 }
 0x807   :  { %v4350_v62 = vpop.eup %4349 }
 0x808   :  { %v1527_v2 = vmul.f32 %v4350_v62, %v4346_v58  ;;  %v4265_v62 = vld [vmem:[%s5436_s7 + $0x38] sm:$0xff]  }
 0x809   :  { %3979 = vmatpush3.bf16.msra.mxu1 %v4265_v62 }
 0x80a   :  { %3980 = vmatprep.subr.bf16.mxu1 %v4411_v29 }
 0x80b   :  { %v4352_v63 = vpop.eup %4351 }
 0x80c   :  { %v1528_v3 = vmul.f32 %v4352_v63, %v4348_v59  ;;  %v4267_v63 = vld [vmem:[%s5436_s7 + $0x28] sm:$0xff]  }
 0x80d   :  { %3981 = vmatpush3.bf16.msra.mxu1 %v4266_v46 }
 0x80e   :  { %v1603_v4 = vpack.c.bf16 %v1528_v3, %v1527_v2  ;;  %3982 = vmatprep.subr.bf16.mxu1 %v4411_v29  ;;  %v4268_v2 = vld [vmem:[%s5436_s7 + $0x20] sm:$0xff]   ;;  %v4269_v3 = vld [vmem:[%s5436_s7 + $0x18] sm:$0xff]  }
 0x810   :  { %3963 = vmatmul.mubr.msk.bf16.vlgmr.msra.gmra.mxu0 %vm935_vm12, %v1603_v4  ;;  %v4270_v4 = vld [vmem:[%s5436_s7 + $0x10] sm:$0xff]  }
 0x811   :  { %3974 = vmatprep.mubr.msk.bf16.mxu0 %vm4412_vm1, %v4411_v29  ;;  %3967 = vmatpush3.bf16.msra.mxu0 %v4261_v39 }
 0x812   :  { %3968 = vmatprep.subr.bf16.mxu0 %v4411_v29  ;;  %3983 = vmatpush3.bf16.msra.mxu1 %v4267_v63 }
 0x813   :  { %3984 = vmatprep.subr.bf16.mxu1 %v4411_v29 }
 0x816   :  { %3985 = vmatpush3.bf16.msra.mxu1 %v4268_v2 }
 0x817   :  { %3986 = vmatprep.subr.bf16.mxu1 %v4411_v29 }
 0x81a   :  { %3987 = vmatpush3.bf16.msra.mxu1 %v4269_v3 }
 0x81b   :  { %3988 = vmatprep.subr.bf16.mxu1 %v4411_v29 }
 0x81e   :  { %3989 = vmatpush3.bf16.msra.mxu1 %v4270_v4 }
 0x81f   :  { %3990 = vmatprep.subr.bf16.mxu1 %v4411_v29 }
 0x8d0   :  { %v1642_v6 = vpop.f32.mrf.mxu0 }
 0x8d1   :  { %v1649_v8 = vadd.f32 %v1642_v6, %v1458_v37  ;;  %v4271_v6 = vld [vmem:[%s5436_s7 + $0x8] sm:$0xff]  }
 0x8d2   :  { %v3964_v10 = vpop.f32.mrf.mxu0  ;;  %3991 = vmatpush3.bf16.msra.mxu1 %v4271_v6  ;;  %v4273_v6 = vld [vmem:[%s5431_s4 + $0x78] sm:$0xff]  }
 0x8d3   :  { %v1651_v12 = vadd.f32 %v1649_v8, %v4641_v11  ;;  %v4272_v8 = vld [vmem:[%s5436_s7] sm:$0xff]   ;;  %3992 = vmatprep.subr.bf16.mxu1 %v4411_v29 }
 0x8d4   :  { %v1645_v53 = vpop.f32.mrf.mxu0 }
 0x8d5   :  { %v4968_v13 = vadd.f32 %v1656_v9, %v1651_v12  ;;  %v1650_v19 = vadd.f32 %v1645_v53, %v1459_v40  ;;  %v4262_v40 = vld [vmem:[%s5435_s6 + $0x10] sm:$0xff]  }
 0x8d6   :  { %v3965_v21 = vpop.f32.mrf.mxu0  ;;  %3969 = vmatpush3.bf16.msra.mxu0 %v4262_v40  ;;  %3993 = vmatpush3.bf16.msra.mxu1 %v4272_v8  ;;  %v4274_v8 = vld [vmem:[%s5431_s4 + $0xb8] sm:$0xff]  }
 0x8d7   :  { %v1652_v22 = vadd.f32 %v1650_v19, %v4645_v16  ;;  %v1659_v23 = vsel %vm606_vm0, %v4968_v13, 0.0  ;;  %3970 = vmatprep.subr.bf16.mxu0 %v4411_v29  ;;  %4022 = vmatprep.subr.bf16.mxu1 %v4411_v29 }
 0x8d8   :  { %1660 = vadd.xlane.f32.xlu0 %v1659_v23 }
 0x8d9   :  { %v4973_v25 = vadd.f32 %v1656_v9, %v1652_v22  ;;  %v605_v9 = vld [vmem:[%s5432_s9 + $0x8] sm:$0x3] }
 0x8da   :  { %3971 = vmatpush3.bf16.msra.mxu0 %v4263_v42  ;;  %v1709_v10 = vrot.slane %v605_v9, %v4694_v45 }
 0x8db   :  { %v1662_v31 = vsel %vm606_vm0, %v4973_v25, 0.0  ;;  %3972 = vmatprep.subr.bf16.mxu0 %v4411_v29 }
 0x8dc   :  { %1663 = vadd.xlane.f32.xlu1 %v1662_v31 }
 0x8de   :  { %3973 = vmatpush3.bf16.msra.mxu0 %v4264_v43 }
 0x8df   :  { %3998 = vmatprep.subr.bf16.mxu0 %v4411_v29 }
 0x961   :  { %v1661_v32 = vpop.xlane.xlu0 %1660 }
 0x962   :  { %v1665_v33 = vmul.f32 0.015625, %v1661_v32 }
 0x964   :  { %v1667_v11 = vsub.f32 %v4968_v13, %v1665_v33 }
 0x965   :  { %v1664_v34 = vpop.xlane.xlu1 %1663 }
 0x966   :  { %v1666_v35 = vmul.f32 0.015625, %v1664_v34  ;;  %v1669_v36 = vmul.f32 %v1667_v11, %v1667_v11 }
 0x968   :  { %v1668_v27 = vsub.f32 %v4973_v25, %v1666_v35  ;;  %v1671_v16 = vsel %vm606_vm0, %v1669_v36, 0.0 }
 0x969   :  { %1672 = vadd.xlane.f32.xlu0 %v1671_v16 }
 0x96a   :  { %v1670_v37 = vmul.f32 %v1668_v27, %v1668_v27 }
 0x96c   :  { %v1674_v38 = vsel %vm606_vm0, %v1670_v37, 0.0 }
 0x96d   :  { %1675 = vadd.xlane.f32.xlu1 %v1674_v38 }
 0x9f2   :  { %v1673_v14 = vpop.xlane.xlu0 %1672 }
 0x9f3   :  { %v1677_v15 = vmul.f32 0.015625, %v1673_v14 }
 0x9f5   :  { %v1679_v17 = vadd.f32 1e-06, %v1677_v15 }
 0x9f6   :  { %v1676_v47 = vpop.xlane.xlu1 %1675 }
 0x9f7   :  { %4353 = vrsqrt.f32 %v1679_v17  ;;  %v1678_v48 = vmul.f32 0.015625, %v1676_v47 }
 0x9f9   :  { %v1680_v49 = vadd.f32 1e-06, %v1678_v48  ;;  %v1816_v48 = vrot.slane %v605_v9, %v4704_v50  ;;  %v4275_v9 = vld [vmem:[%s5431_s4 + $0x70] sm:$0xff]  }
 0x9fb   :  { %4355 = vrsqrt.f32 %v1680_v49 }
 0xa04   :  { %v4354_v24 = vpop.eup %4353 }
 0xa05   :  { %v1683_v26 = vmul.f32 %v4354_v24, %v1667_v11 }
 0xa07   :  { %v1689_v58 = vmul.f32 %v1688_v51, %v1683_v26 }
 0xa08   :  { %v4356_v55 = vpop.eup %4355 }
 0xa09   :  { %v1684_v56 = vmul.f32 %v4356_v55, %v1668_v27  ;;  %v1695_v60 = vadd.f32 %v1694_v57, %v1689_v58 }
 0xa0b   :  { %v1690_v59 = vmul.f32 %v1688_v51, %v1684_v56 }
 0xa0d   :  { %v1696_v1 = vadd.f32 %v1694_v57, %v1690_v59 }
 0xa0f   :  { %v1697_v61 = vpack.c.bf16 %v1696_v1, %v1695_v60 }
 0xa11   :  { %3975 = vmatmul.mubr.msk.bf16.vlgmr.msra.gmra.mxu0 %vm606_vm0, %v1697_v61 }
 0xa12   :  { %4006 = vmatprep.mubr.msk.bf16.mxu0 %vm4412_vm1, %v4411_v29  ;;  %3999 = vmatpush3.bf16.msra.mxu0 %v4273_v6 }
 0xa13   :  { %4000 = vmatprep.subr.bf16.mxu0 %v4411_v29 }
 0xa16   :  { %4001 = vmatpush3.bf16.msra.mxu0 %v4275_v9 }
 0xa17   :  { %4002 = vmatprep.subr.bf16.mxu0 %v4411_v29 }
 0xad1   :  { %v1771_v12 = vpop.f32.mrf.mxu0 }
 0xad2   :  { %v1772_v53 = vadd.f32 %v1771_v12, %v1709_v10  ;;  %v4277_v12 = vld [vmem:[%s5431_s4 + $0x68] sm:$0xff]  }
 0xad3   :  { %v3976_v19 = vpop.f32.mrf.mxu0  ;;  %4003 = vmatpush3.bf16.msra.mxu0 %v4277_v12 }
 0xad4   :  { %v1780_v21 = vmul.f32 0.044715, %v1772_v53  ;;  %v1778_v42 = vmul.f32 0.5, %v1772_v53  ;;  %v4279_v19 = vld [vmem:[%s5431_s4 + $0x60] sm:$0xff]   ;;  %4004 = vmatprep.subr.bf16.mxu0 %v4411_v29 }
 0xad5   :  { %v1774_v22 = vpop.f32.mrf.mxu0 }
 0xad6   :  { %v1782_v23 = vmul.f32 %v1780_v21, %v1772_v53  ;;  %v1775_v31 = vadd.f32 %v1774_v22, %v1709_v10  ;;  %v4276_v10 = vld [vmem:[%s5431_s4 + $0xb0] sm:$0xff]   ;;  %v4280_v21 = vld [vmem:[%s5431_s4 + $0xa0] sm:$0xff]  }
 0xad7   :  { %v3977_v32 = vpop.f32.mrf.mxu0  ;;  %4005 = vmatpush3.bf16.msra.mxu0 %v4279_v19 }
 0xad8   :  { %v1784_v33 = vmul.f32 %v1782_v23, %v1772_v53  ;;  %v1781_v11 = vmul.f32 0.044715, %v1775_v31  ;;  %v1779_v43 = vmul.f32 0.5, %v1775_v31  ;;  %4010 = vmatprep.subr.bf16.mxu0 %v4411_v29 }
 0xada   :  { %v1786_v34 = vadd.f32 %v1784_v33, %v1772_v53  ;;  %v1783_v35 = vmul.f32 %v1781_v11, %v1775_v31  ;;  %v4278_v53 = vld [vmem:[%s5431_s4 + $0xa8] sm:$0xff]  }
 0xadc   :  { %v1788_v36 = vmul.f32 0.7978846, %v1786_v34  ;;  %v1785_v27 = vmul.f32 %v1783_v35, %v1775_v31  ;;  %v5096_v34 = vld [vmem:[%s5432_s9 + $0x10] sm:$0xff] }
 0xadd   :  { %v2043_v12 = vrot.slane %v5096_v34, %v738_v18 }
 0xade   :  { %4357 = vtanh.f32 %v1788_v36  ;;  %v1787_v16 = vadd.f32 %v1785_v27, %v1775_v31  ;;  %v1940_v27 = vrot.slane %v5096_v34, %v4694_v45 }
 0xae0   :  { %v1789_v37 = vmul.f32 0.7978846, %v1787_v16 }
 0xae2   :  { %4359 = vtanh.f32 %v1789_v37 }
 0xaeb   :  { %v4358_v38 = vpop.eup %4357 }
 0xaec   :  { %v1792_v39 = vadd.f32 1.0, %v4358_v38 }
 0xaee   :  { %v1794_v15 = vmul.f32 %v1792_v39, %v1778_v42  ;;  %v1946_v39 = vrot.slane %v5096_v34, %v4704_v50 }
 0xaef   :  { %v4360_v40 = vpop.eup %4359 }
 0xaf0   :  { %v1793_v14 = vadd.f32 1.0, %v4360_v40 }
 0xaf2   :  { %v1795_v17 = vmul.f32 %v1793_v14, %v1779_v43  ;;  %v4281_v14 = vld [vmem:[%s5431_s4 + $0x98] sm:$0xff]  }
 0xaf4   :  { %v1796_v47 = vpack.c.bf16 %v1795_v17, %v1794_v15  ;;  %v4285_v17 = vld [vmem:[%s5433_s5 + $0x98] sm:$0xff]  }
 0xaf6   :  { %3995 = vmatmul.mubr.bf16.vlgmr.msra.gmra.mxu1 %v1796_v47  ;;  %v4282_v47 = vld [vmem:[%s5431_s4 + $0x90] sm:$0xff]  }
 0xaf7   :  { %4030 = vmatprep.mubr.msk.bf16.mxu1 %vm4412_vm1, %v4411_v29  ;;  %4023 = vmatpush3.bf16.msra.mxu1 %v4274_v8 }
 0xaf8   :  { %4024 = vmatprep.subr.bf16.mxu1 %v4411_v29 }
 0xafb   :  { %4025 = vmatpush3.bf16.msra.mxu1 %v4276_v10 }
 0xafc   :  { %4026 = vmatprep.subr.bf16.mxu1 %v4411_v29 }
 0xaff   :  { %4027 = vmatpush3.bf16.msra.mxu1 %v4278_v53 }
 0xb00   :  { %4028 = vmatprep.subr.bf16.mxu1 %v4411_v29 }
 0xb03   :  { %4029 = vmatpush3.bf16.msra.mxu1 %v4280_v21 }
 0xb04   :  { %4040 = vmatprep.subr.bf16.mxu1 %v4411_v29 }
 0xbb6   :  { %v1899_v49 = vpop.f32.mrf.mxu1 }
 0xbb7   :  { %v1900_v24 = vadd.f32 %v1899_v49, %v1816_v48  ;;  %v4283_v49 = vld [vmem:[%s5431_s4 + $0x88] sm:$0xff]  }
 0xbb8   :  { %v3996_v26 = vpop.f32.mrf.mxu1 }
 0xbb9   :  { %v5048_v51 = vadd.f32 %v1900_v24, %v4968_v13  ;;  %v4284_v24 = vld [vmem:[%s5431_s4 + $0x80] sm:$0xff]   ;;  %v4287_v26 = vld [vmem:[%s5433_s5 + $0x88] sm:$0xff]  }
 0xbba   :  { %v1902_v55 = vpop.f32.mrf.mxu1 }
 0xbbb   :  { %v1903_v56 = vadd.f32 %v1902_v55, %v1816_v48  ;;  %v1911_v58 = vsel %vm606_vm0, %v5048_v51, 0.0  ;;  %v4286_v48 = vld [vmem:[%s5433_s5 + $0x90] sm:$0xff]   ;;  %v4288_v55 = vld [vmem:[%s5433_s5 + $0x80] sm:$0xff]  }
 0xbbc   :  { %1912 = vadd.xlane.f32.xlu0 %v1911_v58  ;;  %v3997_v57 = vpop.f32.mrf.mxu1 }
 0xbbd   :  { %v5053_v59 = vadd.f32 %v1903_v56, %v4973_v25  ;;  %v1962_v56 = vrot.slane %v5096_v34, %v4736_v0 }
 0xbbf   :  { %v1914_v60 = vsel %vm606_vm0, %v5053_v59, 0.0 }
 0xbc0   :  { %1915 = vadd.xlane.f32.xlu1 %v1914_v60  ;;  %v2121_v60 = vrot.slane %v5096_v34, %v816_v41 }
 0xc45   :  { %v1913_v1 = vpop.xlane.xlu0 %1912 }
 0xc46   :  { %v1917_v61 = vmul.f32 0.015625, %v1913_v1 }
 0xc48   :  { %v1919_v62 = vsub.f32 %v5048_v51, %v1917_v61 }
 0xc49   :  { %v1916_v13 = vpop.xlane.xlu1 %1915 }
 0xc4a   :  { %v1918_v46 = vmul.f32 0.015625, %v1916_v13  ;;  %v1921_v63 = vmul.f32 %v1919_v62, %v1919_v62 }
 0xc4c   :  { %v1920_v2 = vsub.f32 %v5053_v59, %v1918_v46  ;;  %v1923_v3 = vsel %vm606_vm0, %v1921_v63, 0.0 }
 0xc4d   :  { %1924 = vadd.xlane.f32.xlu0 %v1923_v3 }
 0xc4e   :  { %v1922_v4 = vmul.f32 %v1920_v2, %v1920_v2 }
 0xc50   :  { %v1926_v25 = vsel %vm606_vm0, %v1922_v4, 0.0 }
 0xc51   :  { %1927 = vadd.xlane.f32.xlu1 %v1926_v25 }
 0xcd6   :  { %v1925_v22 = vpop.xlane.xlu0 %1924 }
 0xcd7   :  { %v1929_v23 = vmul.f32 0.015625, %v1925_v22 }
 0xcd9   :  { %v1931_v31 = vadd.f32 1e-06, %v1929_v23 }
 0xcda   :  { %v1928_v32 = vpop.xlane.xlu1 %1927 }
 0xcdb   :  { %4361 = vrsqrt.f32 %v1931_v31  ;;  %v1930_v33 = vmul.f32 0.015625, %v1928_v32 }
 0xcdd   :  { %v1932_v11 = vadd.f32 1e-06, %v1930_v33 }
 0xcdf   :  { %4363 = vrsqrt.f32 %v1932_v11 }
 0xce8   :  { %v4362_v35 = vpop.eup %4361 }
 0xce9   :  { %v1935_v36 = vmul.f32 %v4362_v35, %v1919_v62 }
 0xceb   :  { %v1941_v38 = vmul.f32 %v1940_v27, %v1935_v36  ;;  %v4289_v36 = vld [vmem:[%s5433_s5 + $0xb8] sm:$0xff]  }
 0xcec   :  { %v4364_v16 = vpop.eup %4363 }
 0xced   :  { %v1936_v37 = vmul.f32 %v4364_v16, %v1920_v2  ;;  %v1947_v42 = vadd.f32 %v1946_v39, %v1941_v38  ;;  %v4292_v16 = vld [vmem:[%s5433_s5 + $0xa0] sm:$0xff]  }
 0xcef   :  { %v1942_v40 = vmul.f32 %v1940_v27, %v1936_v37 }
 0xcf1   :  { %v1948_v43 = vadd.f32 %v1946_v39, %v1942_v40 }
 0xcf3   :  { %v1949_v15 = vpack.c.bf16 %v1948_v43, %v1947_v42 }
 0xcf5   :  { %4007 = vmatmul.mubr.msk.bf16.vlgmr.msra.gmra.mxu0 %vm606_vm0, %v1949_v15  ;;  %4031 = vmatmul.mubr.msk.bf16.vlgmr.msra.gmra.mxu1 %vm606_vm0, %v1949_v15 }
 0xcf6   :  { %4011 = vmatpush3.bf16.msra.mxu0 %v4281_v14  ;;  %4018 = vmatprep.mubr.msk.bf16.mxu0 %vm4412_vm1, %v4411_v29 }
 0xcf7   :  { %4012 = vmatprep.subr.bf16.mxu0 %v4411_v29  ;;  %4041 = vmatpush3.bf16.msra.mxu1 %v4285_v17 }
 0xcf8   :  { %4042 = vmatprep.subr.bf16.mxu1 %v4411_v29  ;;  %4048 = vmatprep.mubr.msk.bf16.mxu1 %vm4412_vm1, %v4411_v29 }
 0xcfa   :  { %4013 = vmatpush3.bf16.msra.mxu0 %v4282_v47 }
 0xcfb   :  { %4014 = vmatprep.subr.bf16.mxu0 %v4411_v29  ;;  %4043 = vmatpush3.bf16.msra.mxu1 %v4286_v48 }
 0xcfc   :  { %4044 = vmatprep.subr.bf16.mxu1 %v4411_v29 }
 0xcfe   :  { %4015 = vmatpush3.bf16.msra.mxu0 %v4283_v49 }
 0xcff   :  { %4016 = vmatprep.subr.bf16.mxu0 %v4411_v29  ;;  %4045 = vmatpush3.bf16.msra.mxu1 %v4287_v26 }
 0xd00   :  { %4046 = vmatprep.subr.bf16.mxu1 %v4411_v29 }
 0xd02   :  { %4017 = vmatpush3.bf16.msra.mxu0 %v4284_v24  ;;  %v5218_v24 = vld [vmem:[%s5434_s2] sm:$0xff] }
 0xd03   :  { %4034 = vmatprep.subr.bf16.mxu0 %v4411_v29  ;;  %4047 = vmatpush3.bf16.msra.mxu1 %v4288_v55 }
 0xd04   :  { %4070 = vmatprep.subr.bf16.mxu1 %v4411_v29 }
 0xd05   :  { %4019 = vmatmul.mubr.msk.bf16.vlgmr.msra.gmra.mxu0 %vm606_vm0, %v1949_v15 }
 0xd06   :  { %4036 = vmatprep.mubr.msk.bf16.mxu0 %vm4412_vm1, %v4411_v29 }
 0xdb5   :  { %v2024_v58 = vpop.f32.mrf.mxu0  ;;  %v2180_v57 = vpop.f32.mrf.mxu1 }
 0xdb6   :  { %v2025_v62 = vadd.f32 %v2024_v58, %v1962_v56  ;;  %v2181_v3 = vadd.f32 %v2180_v57, %v2121_v60 }
 0xdb7   :  { %v4008_v1 = vpop.f32.mrf.mxu0  ;;  %v4032_v61 = vpop.f32.mrf.mxu1 }
 0xdb8   :  { %v5149_v6 = vmul.f32 %v2025_v62, %v4747_v7  ;;  %v2189_v33 = vmul.f32 %v2025_v62, %v4772_v28  ;;  %v2340_v35 = vmul.f32 %v2025_v62, %v4775_v30  ;;  %v2573_v38 = vmul.f32 %v2025_v62, %v4841_v54 }
 0xdb9   :  { %v2027_v13 = vpop.f32.mrf.mxu0  ;;  %v2183_v46 = vpop.f32.mrf.mxu1 }
 0xdba   :  { %v2028_v63 = vadd.f32 %v2027_v13, %v1962_v56  ;;  %v2184_v2 = vadd.f32 %v2183_v46, %v2121_v60  ;;  %v5226_v60 = vld [vmem:[%s5434_s2 + $0x8] sm:$0xff] }
 0xdbb   :  { %v4009_v4 = vpop.f32.mrf.mxu0  ;;  %v4033_v25 = vpop.f32.mrf.mxu1 }
 0xdbc   :  { %v5152_v8 = vmul.f32 %v2028_v63, %v4747_v7  ;;  %v5154_v9 = vpack.c.bf16 %v2184_v2, %v2181_v3  ;;  %v2190_v32 = vmul.f32 %v2028_v63, %v4772_v28  ;;  %v2341_v18 = vmul.f32 %v2028_v63, %v4775_v30  ;;  %v4290_v28 = vld [vmem:[%s5433_s5 + $0xb0] sm:$0xff]   ;;  %v4291_v30 = vld [vmem:[%s5433_s5 + $0xa8] sm:$0xff]  }
 0xdbd   :  { %v2574_v37 = vmul.f32 %v2028_v63, %v4841_v54 }
 0xdbe   :  { %v2766_v41 = vpack.c.bf16 %v5152_v8, %v5149_v6  ;;  %4049 = vmatmul.mubr.msk.bf16.vlgmr.msra.gmra.mxu1 %vm606_vm0, %v5154_v9  ;;  %v2191_v11 = vpack.c.bf16 %v2190_v32, %v2189_v33  ;;  %v2342_v27 = vpack.c.bf16 %v2341_v18, %v2340_v35 }
 0xdbf   :  { %4072 = vmatprep.mubr.msk.bf16.mxu1 %vm4412_vm1, %v4411_v29  ;;  %v2575_v39 = vpack.c.bf16 %v2574_v37, %v2573_v38 }
 0xdc5   :  { %v2102_v10 = vpop.f32.mrf.mxu0 }
 0xdc6   :  { %v2103_v7 = vadd.f32 %v2102_v10, %v2043_v12 }
 0xdc7   :  { %v4020_v53 = vpop.f32.mrf.mxu0 }
 0xdc9   :  { %v2105_v19 = vpop.f32.mrf.mxu0 }
 0xdca   :  { %v2106_v21 = vadd.f32 %v2105_v19, %v2043_v12 }
 0xdcb   :  { %v4021_v22 = vpop.f32.mrf.mxu0 }
 0xdcc   :  { %v2187_v23 = vpack.c.bf16 %v2106_v21, %v2103_v7 }
 0xdce   :  { %v5166_v31 = vsel %vm606_vm0, %v2187_v23, 0 }
 0xdcf   :  { %4035 = vmatpush3.bf16.xpose.msra.mxu0 %v5166_v31 }
 0xdd0   :  { %4052 = vmatprep.subr.bf16.mxu0 %v4411_v29 }
 0xdd6   :  { %4037 = vmatmul.mubr.msk.bf16.vlgmr.msra.gmra.mxu0 %vm606_vm0, %v2191_v11 }
 0xdd7   :  { %4053 = vmatpush3.bf16.xpose.msra.mxu0 %v5166_v31  ;;  %4054 = vmatprep.mubr.msk.bf16.mxu0 %vm4412_vm1, %v4411_v29 }
 0xdd8   :  { %4058 = vmatprep.subr.bf16.mxu0 %v4411_v29 }
 0xdde   :  { %4055 = vmatmul.mubr.msk.bf16.vlgmr.msra.gmra.mxu0 %vm606_vm0, %v2342_v27 }
 0xddf   :  { %4059 = vmatpush3.bf16.msra.mxu0 %v4289_v36  ;;  %4066 = vmatprep.mubr.msk.bf16.mxu0 %vm4412_vm1, %v4411_v29 }
 0xde0   :  { %4060 = vmatprep.subr.bf16.mxu0 %v4411_v29 }
 0xde3   :  { %4061 = vmatpush3.bf16.msra.mxu0 %v4290_v28 }
 0xde4   :  { %4062 = vmatprep.subr.bf16.mxu0 %v4411_v29 }
 0xde7   :  { %4063 = vmatpush3.bf16.msra.mxu0 %v4291_v30 }
 0xde8   :  { %4064 = vmatprep.subr.bf16.mxu0 %v4411_v29 }
 0xdeb   :  { %4065 = vmatpush3.bf16.msra.mxu0 %v4292_v16 }
 0xdec   :  { %4082 = vmatprep.subr.bf16.mxu0 %v4411_v29 }
 0xdee   :  { %4067 = vmatmul.mubr.msk.bf16.vlgmr.msra.gmra.mxu0 %vm606_vm0, %v5154_v9 }
 0xdef   :  { %4083 = vmatpush3.bf16.xpose.msra.mxu0 %v5166_v31  ;;  %4084 = vmatprep.mubr.msk.bf16.mxu0 %vm4412_vm1, %v4411_v29 }
 0xdf0   :  { %4100 = vmatprep.subr.bf16.mxu0 %v4411_v29 }
 0xdf6   :  { %4085 = vmatmul.mubr.msk.bf16.vlgmr.msra.gmra.mxu0 %vm606_vm0, %v2575_v39 }
 0xdf7   :  { %4102 = vmatprep.mubr.msk.bf16.mxu0 %vm4412_vm1, %v4411_v29 }
 0xe7e   :  { %v5209_v40 = vpop.f32.mrf.mxu1 }
 0xe80   :  { %v4050_v42 = vpop.f32.mrf.mxu1 }
 0xe82   :  { %v5211_v43 = vpop.f32.mrf.mxu1 }
 0xe83   :  { %v2339_v14 = vpack.c.bf16 %v5211_v43, %v5209_v40  ;;  %v4294_v43 = vld [vmem:[%s5433_s5 + $0xd0] sm:$0xff]  }
 0xe84   :  { %v4051_v15 = vpop.f32.mrf.mxu1 }
 0xe96   :  { %v2232_v17 = vpop.f32.mrf.mxu0 }
 0xe97   :  { %v2233_v56 = vadd.f32 %v5218_v24, %v2232_v17 }
 0xe98   :  { %v4038_v47 = vpop.f32.mrf.mxu0 }
 0xe99   :  { %v2239_v13 = vsel %vm935_vm12, %v2233_v56, -inf }
 0xe9a   :  { %v2235_v48 = vpop.f32.mrf.mxu0 }
 0xe9b   :  { %v2236_v62 = vadd.f32 %v5226_v60, %v2235_v48 }
 0xe9c   :  { %v4039_v49 = vpop.f32.mrf.mxu0 }
 0xe9d   :  { %v2242_v63 = vsel %vm935_vm12, %v2236_v62, -inf }
 0xe9e   :  { %v2380_v54 = vpop.f32.mrf.mxu0 }
 0xe9f   :  { %v2381_v26 = vadd.f32 %v5218_v24, %v2380_v54 }
 0xea0   :  { %v4056_v55 = vpop.f32.mrf.mxu0 }
 0xea1   :  { %v2387_v58 = vsel %vm935_vm12, %v2381_v26, -inf }
 0xea2   :  { %2388 = vmax.xlane.f32.xlu0 %v2387_v58  ;;  %v2383_v57 = vpop.f32.mrf.mxu0 }
 0xea3   :  { %v2384_v1 = vadd.f32 %v5226_v60, %v2383_v57 }
 0xea4   :  { %v4057_v61 = vpop.f32.mrf.mxu0 }
 0xea5   :  { %v2390_v46 = vsel %vm935_vm12, %v2384_v1, -inf }
 0xea6   :  { %2240 = vmax.xlane.f32.xlu0 %v2239_v13  ;;  %2391 = vmax.xlane.f32.xlu1 %v2390_v46 }
 0xeaa   :  { %2243 = vmax.xlane.f32.xlu1 %v2242_v63 }
 0xeae   :  { %v2476_v2 = vpop.f32.mrf.mxu0 }
 0xeb0   :  { %v4068_v3 = vpop.f32.mrf.mxu0 }
 0xeb2   :  { %v2479_v4 = vpop.f32.mrf.mxu0 }
 0xeb3   :  { %v2484_v25 = vpack.c.bf16 %v2479_v4, %v2476_v2 }
 0xeb4   :  { %v4069_v10 = vpop.f32.mrf.mxu0 }
 0xeb5   :  { %4071 = vmatpush3.bf16.msra.mxu1 %v2484_v25 }
 0xeb6   :  { %v2613_v12 = vpop.f32.mrf.mxu0  ;;  %4076 = vmatprep.subr.bf16.mxu1 %v4411_v29 }
 0xeb7   :  { %v2614_v42 = vadd.f32 %v5218_v24, %v2613_v12 }
 0xeb8   :  { %v4086_v53 = vpop.f32.mrf.mxu0 }
 0xeb9   :  { %v2620_v49 = vsel %vm935_vm12, %v2614_v42, -inf }
 0xeba   :  { %v2616_v19 = vpop.f32.mrf.mxu0 }
 0xebb   :  { %v2617_v54 = vadd.f32 %v5226_v60, %v2616_v19 }
 0xebc   :  { %v4087_v7 = vpop.f32.mrf.mxu0 }
 0xf2b   :  { %v2389_v21 = vpop.xlane.xlu0 %2388 }
 0xf2c   :  { %v2393_v22 = vsub.f32 %v2381_v26, %v2389_v21  ;;  %v2623_v26 = vsel %vm935_vm12, %v2617_v54, -inf }
 0xf2e   :  { %v2395_v23 = vmul.f32 1.442695, %v2393_v22 }
 0xf2f   :  { %v2241_v32 = vpop.xlane.xlu0 %2240  ;;  %v2392_v33 = vpop.xlane.xlu1 %2391 }
 0xf30   :  { %4365 = vpow2.f32 %v2395_v23  ;;  %v2245_v11 = vsub.f32 %v2233_v56, %v2241_v32  ;;  %v2394_v18 = vsub.f32 %v2384_v1, %v2392_v33  ;;  %v4293_v23 = vld [vmem:[%s5433_s5 + $0xd8] sm:$0xff]  }
 0xf32   :  { %v2247_v35 = vmul.f32 1.442695, %v2245_v11  ;;  %v2397_v36 = vmul.f32 1.442695, %v2394_v18  ;;  %v4296_v11 = vld [vmem:[%s5433_s5 + $0xc0] sm:$0xff]   ;;  %v4297_v18 = vld [vmem:[%s5433_s5 + $0xf8] sm:$0xff]  }
 0xf33   :  { %v2244_v27 = vpop.xlane.xlu1 %2243 }
 0xf34   :  { %4367 = vpow2.f32 %v2247_v35  ;;  %v2246_v28 = vsub.f32 %v2236_v62, %v2244_v27  ;;  %v4298_v35 = vld [vmem:[%s5433_s5 + $0xf0] sm:$0xff]   ;;  %v4300_v27 = vld [vmem:[%s5433_s5 + $0xe0] sm:$0xff]  }
 0xf35   :  { %4369 = vpow2.f32 %v2397_v36  ;;  %v4299_v36 = vld [vmem:[%s5433_s5 + $0xe8] sm:$0xff]  }
 0xf36   :  { %v2249_v30 = vmul.f32 1.442695, %v2246_v28 }
 0xf38   :  { %4371 = vpow2.f32 %v2249_v30 }
 0xf3d   :  { %v4366_v16 = vpop.eup %4365 }
 0xf3e   :  { %v2399_v37 = vsel %vm935_vm12, %v4366_v16, 0.0 }
 0xf3f   :  { %2400 = vadd.xlane.f32.xlu0 %v2399_v37 }
 0xf41   :  { %v4368_v38 = vpop.eup %4367 }
 0xf42   :  { %v4370_v39 = vpop.eup %4369  ;;  %v2251_v15 = vsel %vm935_vm12, %v4368_v38, 0.0 }
 0xf43   :  { %2252 = vadd.xlane.f32.xlu0 %v2251_v15  ;;  %v2402_v17 = vsel %vm935_vm12, %v4370_v39, 0.0 }
 0xf44   :  { %2403 = vadd.xlane.f32.xlu1 %v2402_v17 }
 0xf45   :  { %v4372_v47 = vpop.eup %4371 }
 0xf46   :  { %v2254_v48 = vsel %vm935_vm12, %v4372_v47, 0.0 }
 0xf47   :  { %2621 = vmax.xlane.f32.xlu0 %v2620_v49 }
 0xf48   :  { %2255 = vadd.xlane.f32.xlu1 %v2254_v48 }
 0xf4c   :  { %2624 = vmax.xlane.f32.xlu1 %v2623_v26 }
 0xfc8   :  { %v2401_v55 = vpop.xlane.xlu0 %2400 }
 0xfc9   :  { %4373 = vrcp.f32 %v2401_v55 }
 0xfcc   :  { %v2253_v56 = vpop.xlane.xlu0 %2252 }
 0xfcd   :  { %v2404_v58 = vpop.xlane.xlu1 %2403 }
 0xfce   :  { %4375 = vrcp.f32 %v2404_v58 }
 0xfd0   :  { %v2622_v57 = vpop.xlane.xlu0 %2621 }
 0xfd1   :  { %v2256_v1 = vpop.xlane.xlu1 %2255  ;;  %v2626_v61 = vsub.f32 %v2614_v42, %v2622_v57 }
 0xfd2   :  { %4377 = vrcp.f32 %v2256_v1 }
 0xfd3   :  { %v2628_v62 = vmul.f32 1.442695, %v2626_v61  ;;  %4379 = vrcp.f32 %v2253_v56 }
 0xfd5   :  { %4381 = vpow2.f32 %v2628_v62  ;;  %v2625_v13 = vpop.xlane.xlu1 %2624 }
 0xfd6   :  { %v2627_v46 = vsub.f32 %v2617_v54, %v2625_v13  ;;  %v4374_v2 = vpop.eup %4373 }
 0xfd7   :  { %v2407_v4 = vmul.f32 %v4374_v2, %v4366_v16 }
 0xfd8   :  { %v2630_v63 = vmul.f32 1.442695, %v2627_v46 }
 0xfda   :  { %4383 = vpow2.f32 %v2630_v63 }
 0xfdb   :  { %v4376_v3 = vpop.eup %4375 }
 0xfdc   :  { %v2408_v25 = vmul.f32 %v4376_v3, %v4370_v39 }
 0xfde   :  { %v2483_v10 = vpack.c.bf16 %v2408_v25, %v2407_v4 }
 0xfdf   :  { %v4378_v12 = vpop.eup %4377 }
 0xfe0   :  { %4073 = vmatmul.mubr.msk.bf16.vlgmr.msra.gmra.mxu1 %vm935_vm12, %v2483_v10  ;;  %v4380_v53 = vpop.eup %4379  ;;  %v2260_v7 = vmul.f32 %v4378_v12, %v4372_v47 }
 0xfe1   :  { %4077 = vmatpush3.bf16.msra.mxu1 %v2339_v14  ;;  %4078 = vmatprep.mubr.msk.bf16.mxu1 %vm4412_vm1, %v4411_v29  ;;  %v2259_v22 = vmul.f32 %v4380_v53, %v4368_v38  ;;  %v4295_v14 = vld [vmem:[%s5433_s5 + $0xc8] sm:$0xff]  }
 0xfe2   :  { %v4382_v19 = vpop.eup %4381  ;;  %4088 = vmatprep.subr.bf16.mxu1 %v4411_v29 }
 0xfe3   :  { %v2632_v21 = vsel %vm935_vm12, %v4382_v19, 0.0  ;;  %v2338_v32 = vpack.c.bf16 %v2260_v7, %v2259_v22 }
 0xfe4   :  { %2633 = vadd.xlane.f32.xlu0 %v2632_v21 }
 0xfe7   :  { %v4384_v33 = vpop.eup %4383 }
 0xfe8   :  { %4079 = vmatmul.mubr.msk.bf16.vlgmr.msra.gmra.mxu1 %vm935_vm12, %v2338_v32  ;;  %v2635_v40 = vsel %vm935_vm12, %v4384_v33, 0.0 }
 0xfe9   :  { %4089 = vmatpush3.bf16.msra.mxu1 %v4293_v23  ;;  %2636 = vadd.xlane.f32.xlu1 %v2635_v40 }
 0xfea   :  { %4090 = vmatprep.subr.bf16.mxu1 %v4411_v29  ;;  %4096 = vmatprep.mubr.msk.bf16.mxu1 %vm4412_vm1, %v4411_v29 }
 0xfed   :  { %4091 = vmatpush3.bf16.msra.mxu1 %v4294_v43 }
 0xfee   :  { %4092 = vmatprep.subr.bf16.mxu1 %v4411_v29 }
 0xff1   :  { %4093 = vmatpush3.bf16.msra.mxu1 %v4295_v14 }
 0xff2   :  { %4094 = vmatprep.subr.bf16.mxu1 %v4411_v29 }
 0xff5   :  { %4095 = vmatpush3.bf16.msra.mxu1 %v4296_v11 }
 0xff6   :  { %4112 = vmatprep.subr.bf16.mxu1 %v4411_v29 }
 0xff8   :  { %4097 = vmatmul.mubr.msk.bf16.vlgmr.msra.gmra.mxu1 %vm606_vm0, %v5154_v9 }
 0xff9   :  { %4113 = vmatpush3.bf16.msra.mxu1 %v4297_v18  ;;  %4120 = vmatprep.mubr.msk.bf16.mxu1 %vm4412_vm1, %v4411_v29 }
 0xffa   :  { %4114 = vmatprep.subr.bf16.mxu1 %v4411_v29 }
 0xffd   :  { %4115 = vmatpush3.bf16.msra.mxu1 %v4298_v35 }
 0xffe   :  { %4116 = vmatprep.subr.bf16.mxu1 %v4411_v29 }
0x1001   :  { %4117 = vmatpush3.bf16.msra.mxu1 %v4299_v36 }
0x1002   :  { %4118 = vmatprep.subr.bf16.mxu1 %v4411_v29 }
0x1005   :  { %4119 = vmatpush3.bf16.msra.mxu1 %v4300_v27 }
0x1006   :  { %4142 = vmatprep.subr.bf16.mxu1 %v4411_v29 }
0x1008   :  { %4121 = vmatmul.mubr.msk.bf16.vlgmr.msra.gmra.mxu1 %vm606_vm0, %v5154_v9 }
0x1009   :  { %4158 = vmatprep.mubr.msk.bf16.mxu1 %vm4412_vm1, %v4411_v29 }
0x106d   :  { %v2634_v17 = vpop.xlane.xlu0 %2633 }
0x1072   :  { %v2637_v39 = vpop.xlane.xlu1 %2636 }
0x1073   :  { %4385 = vrcp.f32 %v2637_v39 }
0x1074   :  { %4387 = vrcp.f32 %v2634_v17 }
0x1080   :  { %v4386_v26 = vpop.eup %4385 }
0x1081   :  { %v4388_v55 = vpop.eup %4387  ;;  %v2641_v58 = vmul.f32 %v4386_v26, %v4384_v33 }
0x1082   :  { %v2640_v61 = vmul.f32 %v4388_v55, %v4382_v19 }
0x1084   :  { %v2716_v62 = vpack.c.bf16 %v2641_v58, %v2640_v61 }
0x10a0   :  { %v2522_v28 = vpop.f32.mrf.mxu1 }
0x10a2   :  { %v4074_v30 = vpop.f32.mrf.mxu1 }
0x10a4   :  { %v2525_v16 = vpop.f32.mrf.mxu1 }
0x10a6   :  { %v4075_v37 = vpop.f32.mrf.mxu1 }
0x10a8   :  { %v2566_v38 = vpop.f32.mrf.mxu1 }
0x10a9   :  { %v2567_v42 = vadd.f32 %v2566_v38, %v2522_v28 }
0x10aa   :  { %v4080_v15 = vpop.f32.mrf.mxu1 }
0x10ab   :  { %v2960_v15 = vrot.slane %v5096_v34, %v1655_v5 }
0x10ac   :  { %v2569_v47 = vpop.f32.mrf.mxu1 }
0x10ad   :  { %v2570_v48 = vadd.f32 %v2569_v47, %v2525_v16 }
0x10ae   :  { %v4081_v49 = vpop.f32.mrf.mxu1 }
0x10b8   :  { %v2709_v54 = vpop.f32.mrf.mxu1 }
0x10ba   :  { %v4098_v9 = vpop.f32.mrf.mxu1 }
0x10bc   :  { %v2712_v56 = vpop.f32.mrf.mxu1 }
0x10bd   :  { %v2717_v57 = vpack.c.bf16 %v2712_v56, %v2709_v54 }
0x10be   :  { %v4099_v1 = vpop.f32.mrf.mxu1 }
0x10bf   :  { %4101 = vmatpush3.bf16.msra.mxu0 %v2717_v57 }
0x10c0   :  { %4106 = vmatprep.subr.bf16.mxu0 %v4411_v29 }
0x10c2   :  { %4103 = vmatmul.mubr.msk.bf16.vlgmr.msra.gmra.mxu0 %vm935_vm12, %v2716_v62 }
0x10c3   :  { %4107 = vmatpush3.bf16.xpose.msra.mxu0 %v5166_v31  ;;  %4108 = vmatprep.mubr.msk.bf16.mxu0 %vm4412_vm1, %v4411_v29 }
0x10c4   :  { %4124 = vmatprep.subr.bf16.mxu0 %v4411_v29 }
0x10c8   :  { %v2900_v13 = vpop.f32.mrf.mxu1 }
0x10ca   :  { %4109 = vmatmul.mubr.msk.bf16.vlgmr.msra.gmra.mxu0 %vm606_vm0, %v2766_v41  ;;  %v4122_v46 = vpop.f32.mrf.mxu1 }
0x10cb   :  { %4126 = vmatprep.mubr.msk.bf16.mxu0 %vm4412_vm1, %v4411_v29 }
0x10cc   :  { %v2903_v63 = vpop.f32.mrf.mxu1 }
0x10cd   :  { %v2908_v2 = vpack.c.bf16 %v2903_v63, %v2900_v13 }
0x10ce   :  { %v4123_v3 = vpop.f32.mrf.mxu1 }
0x10cf   :  { %4125 = vmatpush3.bf16.msra.mxu0 %v2908_v2  ;;  %v4301_v2 = vld [vmem:[%s5435_s6 + $0x38] sm:$0xff]   ;;  %v4302_v3 = vld [vmem:[%s5435_s6 + $0x30] sm:$0xff]  }
0x10d0   :  { %4130 = vmatprep.subr.bf16.mxu0 %v4411_v29 }
0x1182   :  { %v2755_v31 = vpop.f32.mrf.mxu0 }
0x1183   :  { %v2762_v4 = vadd.f32 %v2755_v31, %v2567_v42  ;;  %v4303_v31 = vld [vmem:[%s5435_s6 + $0x28] sm:$0xff]  }
0x1184   :  { %v4104_v25 = vpop.f32.mrf.mxu0 }
0x1186   :  { %v2758_v10 = vpop.f32.mrf.mxu0 }
0x1187   :  { %v2763_v12 = vadd.f32 %v2758_v10, %v2570_v48 }
0x1188   :  { %v4105_v53 = vpop.f32.mrf.mxu0 }
0x118a   :  { %v2804_v19 = vpop.f32.mrf.mxu0 }
0x118b   :  { %v2805_v6 = vadd.f32 %v5218_v24, %v2804_v19 }
0x118c   :  { %v4110_v8 = vpop.f32.mrf.mxu0 }
0x118d   :  { %v2811_v41 = vsel %vm935_vm12, %v2805_v6, -inf }
0x118e   :  { %2812 = vmax.xlane.f32.xlu0 %v2811_v41  ;;  %v2807_v7 = vpop.f32.mrf.mxu0 }
0x118f   :  { %v2808_v21 = vadd.f32 %v5226_v60, %v2807_v7  ;;  %v2992_v7 = vrot.slane %v5096_v34, %v1687_v20  ;;  %v4305_v20 = vld [vmem:[%s5436_s7 + $0x78] sm:$0xff]  }
0x1190   :  { %v4111_v22 = vpop.f32.mrf.mxu0  ;;  %4143 = vmatpush3.bf16.msra.mxu1 %v4305_v20 }
0x1191   :  { %v2814_v23 = vsel %vm935_vm12, %v2808_v21, -inf  ;;  %4144 = vmatprep.subr.bf16.mxu1 %v4411_v29 }
0x1192   :  { %2815 = vmax.xlane.f32.xlu1 %v2814_v23 }
0x1194   :  { %4145 = vmatpush3.bf16.msra.mxu1 %v4306_v44 }
0x1195   :  { %4146 = vmatprep.subr.bf16.mxu1 %v4411_v29 }
0x1217   :  { %v2813_v32 = vpop.xlane.xlu0 %2812 }
0x1218   :  { %v2817_v33 = vsub.f32 %v2805_v6, %v2813_v32  ;;  %v2998_v32 = vrot.slane %v5096_v34, %v1693_v52  ;;  %v4307_v52 = vld [vmem:[%s5436_s7 + $0x68] sm:$0xff]   ;;  %v4308_v34 = vld [vmem:[%s5436_s7 + $0x60] sm:$0xff]  }
0x1219   :  { %4147 = vmatpush3.bf16.msra.mxu1 %v4307_v52 }
0x121a   :  { %v2819_v40 = vmul.f32 1.442695, %v2817_v33  ;;  %4148 = vmatprep.subr.bf16.mxu1 %v4411_v29 }
0x121b   :  { %v2816_v43 = vpop.xlane.xlu1 %2815 }
0x121c   :  { %4389 = vpow2.f32 %v2819_v40  ;;  %v2818_v14 = vsub.f32 %v2808_v21, %v2816_v43 }
0x121d   :  { %4149 = vmatpush3.bf16.msra.mxu1 %v4308_v34 }
0x121e   :  { %v2821_v11 = vmul.f32 1.442695, %v2818_v14  ;;  %4150 = vmatprep.subr.bf16.mxu1 %v4411_v29 }
0x1220   :  { %4391 = vpow2.f32 %v2821_v11  ;;  %v4309_v11 = vld [vmem:[%s5436_s7 + $0x58] sm:$0xff]  }
0x1221   :  { %4151 = vmatpush3.bf16.msra.mxu1 %v4309_v11 }
0x1222   :  { %4152 = vmatprep.subr.bf16.mxu1 %v4411_v29 }
0x1229   :  { %v4390_v24 = vpop.eup %4389 }
0x122a   :  { %v2823_v18 = vsel %vm935_vm12, %v4390_v24, 0.0 }
0x122b   :  { %2824 = vadd.xlane.f32.xlu0 %v2823_v18  ;;  %v4311_v18 = vld [vmem:[%s5436_s7 + $0x48] sm:$0xff]  }
0x122d   :  { %v4392_v35 = vpop.eup %4391 }
0x122e   :  { %v2826_v36 = vsel %vm935_vm12, %v4392_v35, 0.0 }
0x122f   :  { %2827 = vadd.xlane.f32.xlu1 %v2826_v36  ;;  %v3491_v36 = vld [vmem:[%s5432_s9 + $0x18] sm:$0x3] }
0x12b4   :  { %v2825_v60 = vpop.xlane.xlu0 %2824 }
0x12b5   :  { %4393 = vrcp.f32 %v2825_v60  ;;  %v3014_v60 = vrot.slane %v3491_v36, %v4694_v45 }
0x12b8   :  { %v2828_v27 = vpop.xlane.xlu1 %2827 }
0x12b9   :  { %4395 = vrcp.f32 %v2828_v27 }
0x12c2   :  { %v4394_v28 = vpop.eup %4393 }
0x12c3   :  { %v2831_v16 = vmul.f32 %v4394_v28, %v4390_v24  ;;  %v4310_v24 = vld [vmem:[%s5436_s7 + $0x50] sm:$0xff]  }
0x12c4   :  { %4153 = vmatpush3.bf16.msra.mxu1 %v4310_v24 }
0x12c5   :  { %4154 = vmatprep.subr.bf16.mxu1 %v4411_v29 }
0x12c6   :  { %v4396_v30 = vpop.eup %4395 }
0x12c7   :  { %v2832_v37 = vmul.f32 %v4396_v30, %v4392_v35  ;;  %v4312_v35 = vld [vmem:[%s5436_s7 + $0x40] sm:$0xff]  }
0x12c8   :  { %4155 = vmatpush3.bf16.msra.mxu1 %v4311_v18  ;;  %v3214_v18 = vld [vmem:[%s5438_s10] sm:$0x7] }
0x12c9   :  { %v2907_v38 = vpack.c.bf16 %v2832_v37, %v2831_v16  ;;  %4156 = vmatprep.subr.bf16.mxu1 %v4411_v29 }
0x12cb   :  { %4127 = vmatmul.mubr.msk.bf16.vlgmr.msra.gmra.mxu0 %vm935_vm12, %v2907_v38 }
0x12cc   :  { %4138 = vmatprep.mubr.msk.bf16.mxu0 %vm4412_vm1, %v4411_v29  ;;  %4131 = vmatpush3.bf16.msra.mxu0 %v4301_v2 }
0x12cd   :  { %4132 = vmatprep.subr.bf16.mxu0 %v4411_v29  ;;  %4157 = vmatpush3.bf16.msra.mxu1 %v4312_v35 }
0x12d0   :  { %4133 = vmatpush3.bf16.msra.mxu0 %v4302_v3 }
0x12d1   :  { %4134 = vmatprep.subr.bf16.mxu0 %v4411_v29 }
0x12d4   :  { %4135 = vmatpush3.bf16.msra.mxu0 %v4303_v31 }
0x12d5   :  { %4136 = vmatprep.subr.bf16.mxu0 %v4411_v29 }
0x138b   :  { %v2946_v39 = vpop.f32.mrf.mxu0 }
0x138c   :  { %v2953_v42 = vadd.f32 %v2946_v39, %v2762_v4  ;;  %v4304_v4 = vld [vmem:[%s5435_s6 + $0x20] sm:$0xff]  }
0x138d   :  { %v4128_v17 = vpop.f32.mrf.mxu0  ;;  %4137 = vmatpush3.bf16.msra.mxu0 %v4304_v4 }
0x138e   :  { %v2955_v47 = vadd.f32 %v2953_v42, %v5048_v51  ;;  %4162 = vmatprep.subr.bf16.mxu0 %v4411_v29 }
0x138f   :  { %v2949_v48 = vpop.f32.mrf.mxu0 }
0x1390   :  { %v5320_v49 = vadd.f32 %v2960_v15, %v2955_v47  ;;  %v2954_v54 = vadd.f32 %v2949_v48, %v2763_v12 }
0x1391   :  { %v4129_v26 = vpop.f32.mrf.mxu0 }
0x1392   :  { %v2956_v9 = vadd.f32 %v2954_v54, %v5053_v59  ;;  %v2963_v55 = vsel %vm606_vm0, %v5320_v49, 0.0 }
0x1393   :  { %2964 = vadd.xlane.f32.xlu0 %v2963_v55 }
0x1394   :  { %v5325_v56 = vadd.f32 %v2960_v15, %v2956_v9 }
0x1396   :  { %v2966_v58 = vsel %vm606_vm0, %v5325_v56, 0.0 }
0x1397   :  { %2967 = vadd.xlane.f32.xlu1 %v2966_v58 }
0x141c   :  { %v2965_v5 = vpop.xlane.xlu0 %2964 }
0x141d   :  { %v2969_v57 = vmul.f32 0.015625, %v2965_v5 }
0x141f   :  { %v2971_v51 = vsub.f32 %v5320_v49, %v2969_v57 }
0x1420   :  { %v2968_v1 = vpop.xlane.xlu1 %2967 }
0x1421   :  { %v2970_v61 = vmul.f32 0.015625, %v2968_v1  ;;  %v2973_v62 = vmul.f32 %v2971_v51, %v2971_v51 }
0x1423   :  { %v2972_v13 = vsub.f32 %v5325_v56, %v2970_v61  ;;  %v2975_v59 = vsel %vm606_vm0, %v2973_v62, 0.0 }
0x1424   :  { %2976 = vadd.xlane.f32.xlu0 %v2975_v59 }
0x1425   :  { %v2974_v46 = vmul.f32 %v2972_v13, %v2972_v13 }
0x1427   :  { %v2978_v63 = vsel %vm606_vm0, %v2974_v46, 0.0  ;;  %v3122_v46 = vrot.slane %v3491_v36, %v4704_v50 }
0x1428   :  { %2979 = vadd.xlane.f32.xlu1 %v2978_v63 }
0x14ad   :  { %v2977_v25 = vpop.xlane.xlu0 %2976 }
0x14ae   :  { %v2981_v10 = vmul.f32 0.015625, %v2977_v25 }
0x14b0   :  { %v2983_v12 = vadd.f32 1e-06, %v2981_v10 }
0x14b1   :  { %v2980_v53 = vpop.xlane.xlu1 %2979 }
0x14b2   :  { %4397 = vrsqrt.f32 %v2983_v12  ;;  %v2982_v19 = vmul.f32 0.015625, %v2980_v53 }
0x14b4   :  { %v2984_v6 = vadd.f32 1e-06, %v2982_v19 }
0x14b6   :  { %4399 = vrsqrt.f32 %v2984_v6 }
0x14bf   :  { %v4398_v8 = vpop.eup %4397 }
0x14c0   :  { %v2987_v41 = vmul.f32 %v4398_v8, %v2971_v51 }
0x14c2   :  { %v2993_v23 = vmul.f32 %v2992_v7, %v2987_v41 }
0x14c3   :  { %v4400_v21 = vpop.eup %4399 }
0x14c4   :  { %v2988_v22 = vmul.f32 %v4400_v21, %v2972_v13  ;;  %v2999_v40 = vadd.f32 %v2998_v32, %v2993_v23 }
0x14c6   :  { %v2994_v33 = vmul.f32 %v2992_v7, %v2988_v22 }
0x14c8   :  { %v3000_v43 = vadd.f32 %v2998_v32, %v2994_v33 }
0x14ca   :  { %v3001_v14 = vpack.c.bf16 %v3000_v43, %v2999_v40  ;;  %v4314_v40 = vld [vmem:[%s5437_s8 + $0x10] sm:$0xff]   ;;  %v4315_v43 = vld [vmem:[%s5437_s8 + $0x8] sm:$0xff]  }
0x14cc   :  { %4139 = vmatmul.mubr.msk.bf16.vlgmr.msra.gmra.mxu0 %vm606_vm0, %v3001_v14  ;;  %v4316_v14 = vld [vmem:[%s5437_s8] sm:$0xff]  }
0x14cd   :  { %4170 = vmatprep.mubr.msk.bf16.mxu0 %vm4412_vm1, %v4411_v29 }
0x158c   :  { %v3076_v27 = vpop.f32.mrf.mxu0 }
0x158d   :  { %v3077_v28 = vadd.f32 %v3076_v27, %v3014_v60 }
0x158e   :  { %v4140_v30 = vpop.f32.mrf.mxu0 }
0x158f   :  { %v3085_v16 = vmul.f32 0.044715, %v3077_v28  ;;  %v3083_v51 = vmul.f32 0.5, %v3077_v28  ;;  %v3250_v30 = vrot.slane %v3214_v18, %v4704_v50 }
0x1590   :  { %v3079_v37 = vpop.f32.mrf.mxu0 }
0x1591   :  { %v3087_v38 = vmul.f32 %v3085_v16, %v3077_v28  ;;  %v3080_v39 = vadd.f32 %v3079_v37, %v3014_v60  ;;  %v3244_v60 = vrot.slane %v3214_v18, %v4694_v45 }
0x1592   :  { %v4141_v42 = vpop.f32.mrf.mxu0 }
0x1593   :  { %v3089_v15 = vmul.f32 %v3087_v38, %v3077_v28  ;;  %v3086_v17 = vmul.f32 0.044715, %v3080_v39  ;;  %v3084_v1 = vmul.f32 0.5, %v3080_v39  ;;  %v3265_v42 = vrot.slane %v3214_v18, %v4736_v0 }
0x1595   :  { %v3091_v47 = vadd.f32 %v3089_v15, %v3077_v28  ;;  %v3088_v48 = vmul.f32 %v3086_v17, %v3080_v39 }
0x1597   :  { %v3093_v54 = vmul.f32 0.7978846, %v3091_v47  ;;  %v3090_v26 = vmul.f32 %v3088_v48, %v3080_v39 }
0x1599   :  { %4401 = vtanh.f32 %v3093_v54  ;;  %v3092_v9 = vadd.f32 %v3090_v26, %v3080_v39 }
0x159b   :  { %v3094_v55 = vmul.f32 0.7978846, %v3092_v9 }
0x159d   :  { %4403 = vtanh.f32 %v3094_v55 }
0x15a6   :  { %v4402_v58 = vpop.eup %4401 }
0x15a7   :  { %v3097_v5 = vadd.f32 1.0, %v4402_v58 }
0x15a9   :  { %v3099_v62 = vmul.f32 %v3097_v5, %v3083_v51 }
0x15aa   :  { %v4404_v57 = vpop.eup %4403 }
0x15ab   :  { %v3098_v61 = vadd.f32 1.0, %v4404_v57 }
0x15ad   :  { %v3100_v13 = vmul.f32 %v3098_v61, %v3084_v1 }
0x15af   :  { %v3101_v59 = vpack.c.bf16 %v3100_v13, %v3099_v62 }
0x15b1   :  { %4159 = vmatmul.mubr.bf16.vlgmr.msra.gmra.mxu1 %v3101_v59 }
0x1671   :  { %v3205_v63 = vpop.f32.mrf.mxu1 }
0x1672   :  { %v3206_v2 = vadd.f32 %v3205_v63, %v3122_v46 }
0x1673   :  { %v4160_v3 = vpop.f32.mrf.mxu1 }
0x1674   :  { %v3212_v31 = vadd.f32 %v3206_v2, %v5320_v49 }
0x1675   :  { %v3208_v4 = vpop.f32.mrf.mxu1 }
0x1676   :  { %v3209_v25 = vadd.f32 %v3208_v4, %v3122_v46  ;;  %v3215_v10 = vsel %vm606_vm0, %v3212_v31, 0.0 }
0x1677   :  { %3216 = vadd.xlane.f32.xlu0 %v3215_v10  ;;  %v4161_v12 = vpop.f32.mrf.mxu1 }
0x1678   :  { %v3213_v53 = vadd.f32 %v3209_v25, %v5325_v56  ;;  %v4313_v56 = vld [vmem:[%s5437_s8 + $0x18] sm:$0xff]  }
0x1679   :  { %4163 = vmatpush3.bf16.msra.mxu0 %v4313_v56 }
0x167a   :  { %v3218_v19 = vsel %vm606_vm0, %v3213_v53, 0.0  ;;  %4164 = vmatprep.subr.bf16.mxu0 %v4411_v29 }
0x167b   :  { %3219 = vadd.xlane.f32.xlu1 %v3218_v19 }
0x167d   :  { %4165 = vmatpush3.bf16.msra.mxu0 %v4314_v40 }
0x167e   :  { %4166 = vmatprep.subr.bf16.mxu0 %v4411_v29 }
0x1681   :  { %4167 = vmatpush3.bf16.msra.mxu0 %v4315_v43 }
0x1682   :  { %4168 = vmatprep.subr.bf16.mxu0 %v4411_v29 }
0x1685   :  { %4169 = vmatpush3.bf16.msra.mxu0 %v4316_v14 }
0x1700   :  { %v3217_v6 = vpop.xlane.xlu0 %3216 }
0x1701   :  { %v3221_v8 = vmul.f32 0.015625, %v3217_v6 }
0x1703   :  { %v3223_v41 = vsub.f32 %v3212_v31, %v3221_v8 }
0x1704   :  { %v3220_v7 = vpop.xlane.xlu1 %3219 }
0x1705   :  { %v3222_v21 = vmul.f32 0.015625, %v3220_v7  ;;  %v3225_v22 = vmul.f32 %v3223_v41, %v3223_v41 }
0x1707   :  { %v3224_v23 = vsub.f32 %v3213_v53, %v3222_v21  ;;  %v3227_v49 = vsel %vm606_vm0, %v3225_v22, 0.0 }
0x1708   :  { %3228 = vadd.xlane.f32.xlu0 %v3227_v49 }
0x1709   :  { %v3226_v32 = vmul.f32 %v3224_v23, %v3224_v23 }
0x170b   :  { %v3230_v33 = vsel %vm606_vm0, %v3226_v32, 0.0 }
0x170c   :  { %3231 = vadd.xlane.f32.xlu1 %v3230_v33 }
0x1791   :  { %v3229_v20 = vpop.xlane.xlu0 %3228 }
0x1792   :  { %v3233_v44 = vmul.f32 0.015625, %v3229_v20 }
0x1794   :  { %v3235_v52 = vadd.f32 1e-06, %v3233_v44 }
0x1795   :  { %v3232_v34 = vpop.xlane.xlu1 %3231 }
0x1796   :  { %4405 = vrsqrt.f32 %v3235_v52  ;;  %v3234_v11 = vmul.f32 0.015625, %v3232_v34 }
0x1798   :  { %v3236_v24 = vadd.f32 1e-06, %v3234_v11 }
0x179a   :  { %4407 = vrsqrt.f32 %v3236_v24 }
0x17a3   :  { %v4406_v35 = vpop.eup %4405 }
0x17a4   :  { %v3239_v36 = vmul.f32 %v4406_v35, %v3223_v41 }
0x17a6   :  { %v3245_v29 = vmul.f32 %v3244_v60, %v3239_v36 }
0x17a7   :  { %v4408_v27 = vpop.eup %4407 }
0x17a8   :  { %v3240_v28 = vmul.f32 %v4408_v27, %v3224_v23  ;;  %v3251_v37 = vadd.f32 %v3250_v30, %v3245_v29 }
0x17aa   :  { %v3246_v16 = vmul.f32 %v3244_v60, %v3240_v28 }
0x17ac   :  { %v3252_v38 = vadd.f32 %v3250_v30, %v3246_v16 }
0x17ae   :  { %v3253_v39 = vpack.c.bf16 %v3252_v38, %v3251_v37 }
0x17b0   :  { %4171 = vmatmul.mubr.msk.bf16.vlgmr.msra.gmra.mxu0 %vm606_vm0, %v3253_v39 }
0x1870   :  { %v3327_v15 = vpop.f32.mrf.mxu0 }
0x1871   :  { %v3328_v17 = vadd.f32 %v3327_v15, %v3265_v42 }
0x1872   :  { %v4172_v47 = vpop.f32.mrf.mxu0 }
0x1873   :  { %3334 = vst [vmem:[%s5439_s11] sm:$0xff] %v3328_v17 }
0x1874   :  { %v3330_v45 = vpop.f32.mrf.mxu0 }
0x1875   :  { %v3331_v48 = vadd.f32 %v3330_v45, %v3265_v42 }
0x1876   :  { %v4173_v54 = vpop.f32.mrf.mxu0 }
0x1877   :  { %3335 = vst [vmem:[%s5439_s11 + $0x8] sm:$0xff] %v3331_v48 }

</bundles_post_ra>
